<compile_context>
chip_gen: v5e
topology: v5e:2x2
jax: 0.10.0
libtpu: 0.0.40
codegen_flags: <defaults>
</compile_context>

<pallas_src>
import functools

import jax
import jax.numpy as jnp
from jax import lax
from jax.experimental import pallas as pl
from jax.experimental.pallas import tpu as pltpu

_LANE = 128
_SUBLANE = 8
_MAX_TILE_ROWS = 8192                   # 8192 x 128 f32 = 4 MiB per operand block
_VMEM_LIMIT_BYTES = 40 * 1024 * 1024    # 2 streams x 2 slots x 4 MiB + headroom


def _num_tensorcores() -> int:
    """Best-effort TensorCores-per-device (size of the 'parallel' grid axis).

    Returning 2 is always functionally correct (a 2-step serial outer grid on
    1-TC chips); returning 1 on v5e/v6e just drops the redundant grid level."""
    try:
        kind = jax.devices()[0].device_kind.lower()
    except Exception:
        return 2
    if any(tag in kind for tag in ("lite", "v5e", "v6e", "v2", "v3")):
        return 1
    return 2  # v4 / v5p / v7x style megacore chips


def _assign_cores(row_counts, ncores):
    """Greedy static load-balance of features across TensorCores."""
    totals = [0] * ncores
    assign = [0] * len(row_counts)
    for f in sorted(range(len(row_counts)), key=lambda i: -row_counts[i]):
        c = min(range(ncores), key=lambda k: totals[k])
        assign[f] = c
        totals[c] += row_counts[f]
    return assign


# ----------------------------- Pallas forward -------------------------------
def _weighted_l1_forward(x_feats, y_feats, weights):
    """sum_i weights[i] * mean(|x_feats[i] - y_feats[i]|) in one pallas_call.

    Each feature pair is only *reshaped* to a lane-dense (rows_i, 128) view
    (no cross-feature concat, no row padding).  The kernel DMAs big row tiles
    directly from each feature with manual double buffering and accumulates
    pre-scaled |a-b| into a resident (8,128) block per TensorCore."""
    nf = len(x_feats)
    assert nf == len(y_feats) == len(weights) and nf > 0

    x2d, y2d, rows_l, scale_l = [], [], [], []
    for xf, yf, w in zip(x_feats, y_feats, weights):
        assert xf.shape == yf.shape
        n = xf.size
        xa, ya = xf.reshape(-1), yf.reshape(-1)
        lane_pad = (-n) % _LANE
        if lane_pad:
            # Rare path (numel not a multiple of 128).  BOTH operands get
            # identical zero pads so |pad - pad| = 0; the mean divisor below
            # stays the true numel n.  Do not pad only one side.
            xa = jnp.pad(xa, (0, lane_pad))
            ya = jnp.pad(ya, (0, lane_pad))
        rows = (n + lane_pad) // _LANE
        x2d.append(xa.reshape(rows, _LANE))
        y2d.append(ya.reshape(rows, _LANE))
        rows_l.append(rows)
        scale_l.append(float(w) / float(n))  # folds weight + L1-mean divisor

    x_dtype = x2d[0].dtype
    y_dtype = y2d[0].dtype
    assert all(a.dtype == x_dtype for a in x2d)
    assert all(a.dtype == y_dtype for a in y2d)

    # Per-feature static tiling plan: tr multiple of 8, tr | (rows - rem).
    tiles = []
    for rows in rows_l:
        tr = max(_SUBLANE, min(_MAX_TILE_ROWS, (rows // _SUBLANE) * _SUBLANE))
        nfull = rows // tr
        rem = rows - nfull * tr          # always < tr
        tiles.append((tr, nfull, rem))
    buf_rows = max(max(tr, rem) for tr, _, rem in tiles)

    ncores = _num_tensorcores()
    assign = _assign_cores(rows_l, ncores)

    def kernel(*refs):
        x_refs = refs[:nf]
        y_refs = refs[nf:2 * nf]
        o_ref = refs[2 * nf]
        x_buf, y_buf, sem = refs[2 * nf + 1:]
        core = pl.program_id(0)

        o_ref[...] = jnp.zeros_like(o_ref)

        def feature_body(f):
            tr, nfull, rem = tiles[f]
            scale = scale_l[f]
            x_hbm, y_hbm = x_refs[f], y_refs[f]

            def start(row0, nrows, slot):
                pltpu.make_async_copy(x_hbm.at[pl.ds(row0, nrows)],
                                      x_buf.at[slot, pl.ds(0, nrows)],
                                      sem.at[0, slot]).start()
                pltpu.make_async_copy(y_hbm.at[pl.ds(row0, nrows)],
                                      y_buf.at[slot, pl.ds(0, nrows)],
                                      sem.at[1, slot]).start()

            def wait(nrows, slot):
                pltpu.make_async_copy(x_hbm.at[pl.ds(0, nrows)],
                                      x_buf.at[slot, pl.ds(0, nrows)],
                                      sem.at[0, slot]).wait()
                pltpu.make_async_copy(y_hbm.at[pl.ds(0, nrows)],
                                      y_buf.at[slot, pl.ds(0, nrows)],
                                      sem.at[1, slot]).wait()

            def accum(nrows, slot):
                xb = x_buf[slot, pl.ds(0, nrows)].astype(jnp.float32)
                yb = y_buf[slot, pl.ds(0, nrows)].astype(jnp.float32)
                d = jnp.abs(xb - yb)
                if nrows % _SUBLANE == 0:
                    # vreg-shaped fold: pure VPU adds, no cross-lane reduce,
                    # no masked sub-128-lane stores.
                    o_ref[...] += scale * jnp.sum(
                        d.reshape(nrows // _SUBLANE, _SUBLANE, _LANE), axis=0)
                else:
                    # ragged tail (at most once per feature): tiny XLU reduce.
                    o_ref[0:1, :] += scale * jnp.sum(d, axis=0, keepdims=True)

            if nfull == 1:
                # Single full block: straight-line DMA + compute.
                start(0, tr, 0)
                wait(tr, 0)
                accum(tr, 0)
            elif nfull > 1:
                # Classic double-buffered pipeline over the full blocks.
                start(0, tr, 0)

                def body(j, carry):
                    slot = j % 2
                    wait(tr, slot)

                    @pl.when(j + 1 < nfull)
                    def _():
                        start(pl.multiple_of((j + 1) * tr, _SUBLANE), tr,
                              1 - slot)

                    accum(tr, slot)
                    return carry

                lax.fori_loop(0, nfull, body, 0)

            if rem > 0:
                # Static tail peel (every earlier DMA on these sems was waited).
                start(nfull * tr, rem, 0)
                wait(rem, 0)
                accum(rem, 0)

        for f in range(nf):
            # Static feature -> core assignment.  On 1-TC chips the grid is
            # (1,) and every condition is trivially true.
            pl.when(core == assign[f])(functools.partial(feature_body, f))

    out = pl.pallas_call(
        kernel,
        out_shape=jax.ShapeDtypeStruct((ncores * _SUBLANE, _LANE), jnp.float32),
        grid_spec=pltpu.PrefetchScalarGridSpec(
            num_scalar_prefetch=0,
            grid=(ncores,),
            in_specs=[pl.BlockSpec(memory_space=pl.ANY)] * (2 * nf),
            out_specs=pl.BlockSpec((_SUBLANE, _LANE), lambda c: (c, 0)),
            scratch_shapes=[
                pltpu.VMEM((2, buf_rows, _LANE), x_dtype),   # x double buffer
                pltpu.VMEM((2, buf_rows, _LANE), y_dtype),   # y double buffer
                pltpu.SemaphoreType.DMA((2, 2)),             # [stream, slot]
            ],
        ),
        compiler_params=pltpu.CompilerParams(
            dimension_semantics=("parallel",),
            vmem_limit_bytes=_VMEM_LIMIT_BYTES,
        ),
    )(*x2d, *y2d)

    # Single tiny final reduction of the per-core (8,128) partial-sum blocks.
    return jnp.sum(out)


def fused_weighted_l1_loss(x_feats, y_feats, weights):
    """Pallas forward + custom VJP (grad to x only; y side is detached)."""
    weights = tuple(float(w) for w in weights)

    @jax.custom_vjp
    def _loss(xs, ys):
        return _weighted_l1_forward(xs, ys, weights)

    def _fwd(xs, ys):
        return _weighted_l1_forward(xs, ys, weights), (xs, ys)

    def _bwd(res, g):
        xs, ys = res
        dxs, dys = [], []
        for xf, yf, w in zip(xs, ys, weights):
            s = w / float(xf.size)
            sgn = jnp.sign(xf.astype(jnp.float32) - yf.astype(jnp.float32))
            dxs.append(((g * s) * sgn).astype(xf.dtype))
            dys.append(jnp.zeros_like(yf))   # matches y_feat.detach()
        return dxs, dys

    _loss.defvjp(_fwd, _bwd)
    return _loss(list(x_feats), list(y_feats))


# ---------------------- synthetic discriminator D ---------------------------
class SyntheticHCN:
    """TODO(synk): the real D.extract_feature is an external HCN discriminator
    not defined in the reference module; this deterministic stand-in (6 stages
    of 1x1 conv + ReLU) gives the loss the same structure: 6 weighted L1 terms."""

    def __init__(self, in_channels, key):
        self.stage_channels = [16, 32, 64, 64, 32, 16]
        self.params = []
        c_in = in_channels
        for c_out in self.stage_channels:
            key, sub = jax.random.split(key)
            w = jax.random.normal(sub, (c_in, c_out), jnp.float32) / jnp.sqrt(
                jnp.float32(c_in))
            self.params.append(w)
            c_in = c_out

    def eval(self):  # mirrors D.eval(); no-op for this synthetic forward
        return self

    def extract_feature(self, x):
        # x: (B, C, H, W) NCHW at the module boundary (PyTorch convention).
        # Run channels-last internally so the 1x1-conv channel contraction maps
        # onto the MXU lanes; the L1-mean loss is layout-invariant.
        # NOTE(perf review): for real HCN sizes these small-channel contractions
        # underfill the 128/256-wide MXU; run them in bf16 and/or pad channel
        # dims toward 128/256 (or fuse stages) — that path, not the L1 kernel,
        # dominates wall-clock at production shapes.
        h = jnp.transpose(x, (0, 2, 3, 1))
        feats = []
        for w in self.params:
            h = jax.nn.relu(jnp.einsum("bhwc,cd->bhwd", h, w))
            feats.append(h)
        return feats


# ------------------------------ HCNLoss --------------------------------------
class HCNLoss:
    def __init__(self):
        self.weights = [1.0, 1.0, 1.0, 1.0, 1.0, 1.0]

    def __call__(self, D, x, y):
        D.eval()
        x_gcn = D.extract_feature(x)
        # .detach() -> stop_gradient (forward value unchanged)
        y_gcn = [jax.lax.stop_gradient(f) for f in D.extract_feature(y)]
        return fused_weighted_l1_loss(x_gcn, y_gcn, self.weights)


# ------------------------------- main ----------------------------------------
if __name__ == "__main__":
    key = jax.random.PRNGKey(0)
    kx, ky, kd = jax.random.split(key, 3)

    B, C, H, W = 2, 3, 16, 16  # small NCHW inputs
    x = jax.random.normal(kx, (B, C, H, W), jnp.float32)
    y = jax.random.normal(ky, (B, C, H, W), jnp.float32)

    D = SyntheticHCN(C, kd)
    hcn_loss = HCNLoss()

    loss_fn = jax.jit(lambda xa, ya: hcn_loss(D, xa, ya))
    loss = loss_fn(x, y)
    jax.block_until_ready(loss)

    # --- forward check against a plain-JAX reference -------------------------
    xf, yf = D.extract_feature(x), D.extract_feature(y)
    ref = jnp.float32(0.0)
    for i in range(len(xf)):
        ref = ref + hcn_loss.weights[i] * jnp.mean(jnp.abs(xf[i] - yf[i]))
    assert jnp.allclose(loss, ref, rtol=1e-5, atol=1e-5), (loss, ref)

    # --- backward check (custom VJP; torch L1 convention: sign(0) = 0) -------
    grad_fn = jax.jit(jax.grad(lambda xa: hcn_loss(D, xa, y)))
    gx = grad_fn(x)
    jax.block_until_ready(gx)

    xf2, pullback = jax.vjp(D.extract_feature, x)
    yf2 = D.extract_feature(y)
    cots = [hcn_loss.weights[i] / xf2[i].size * jnp.sign(xf2[i] - yf2[i])
            for i in range(len(xf2))]
    (gx_ref,) = pullback(cots)
    assert gx.shape == x.shape
    assert jnp.allclose(gx, gx_ref, rtol=1e-4, atol=1e-7), float(
        jnp.max(jnp.abs(gx - gx_ref)))

    print("KERNEL_OK")
</pallas_src>

<mosaic_0001>
module attributes {stable_mosaic.version = 11 : i64} {
  func.func @kernel(%arg0: i32, %arg1: memref<64x128xf32, #tpu.memory_space<any>>, %arg2: memref<128x128xf32, #tpu.memory_space<any>>, %arg3: memref<256x128xf32, #tpu.memory_space<any>>, %arg4: memref<256x128xf32, #tpu.memory_space<any>>, %arg5: memref<128x128xf32, #tpu.memory_space<any>>, %arg6: memref<64x128xf32, #tpu.memory_space<any>>, %arg7: memref<64x128xf32, #tpu.memory_space<any>>, %arg8: memref<128x128xf32, #tpu.memory_space<any>>, %arg9: memref<256x128xf32, #tpu.memory_space<any>>, %arg10: memref<256x128xf32, #tpu.memory_space<any>>, %arg11: memref<128x128xf32, #tpu.memory_space<any>>, %arg12: memref<64x128xf32, #tpu.memory_space<any>>, %arg13: memref<8x128xf32, #tpu.memory_space<vmem>>, %arg14: memref<2x256x128xf32, #tpu.memory_space<vmem>>, %arg15: memref<2x256x128xf32, #tpu.memory_space<vmem>>, %arg16: memref<2x2x!tpu.dma_semaphore, #tpu.memory_space<semaphore_mem>>) attributes {dimension_semantics = [#tpu.dimension_semantics<parallel>], iteration_bounds = array<i64: 2>, scalar_prefetch = 0 : i64, scratch_operands = 3 : i64, tpu.core_type = #tpu.core_type<tc>, window_params = [{}, {}, {}, {}, {}, {}, {}, {}, {}, {}, {}, {}, {transform_indices = @transform_12, window_bounds = array<i64: 8, 128>}]} {
    %cst = arith.constant 0.000000e+00 : f32
    %0 = vector.broadcast %cst : f32 to vector<8x128xf32>
    %c0 = arith.constant 0 : index
    %c0_0 = arith.constant 0 : index
    %1 = vector.load %arg13[%c0, %c0_0] : memref<8x128xf32, #tpu.memory_space<vmem>>, vector<8x128xf32>
    tpu.vector_store %arg13[%c0, %c0_0], %0 {strides = array<i32>} : memref<8x128xf32, #tpu.memory_space<vmem>>, vector<8x128xf32>,
    %c0_i32 = arith.constant 0 : i32
    %2 = arith.cmpi eq, %arg0, %c0_i32 : i32
    %3 = arith.extui %2 : i1 to i32
    %c0_i32_1 = arith.constant 0 : i32
    %4 = arith.cmpi ne, %3, %c0_i32_1 : i32
    scf.if %4 {
      %c0_i32_11 = arith.constant 0 : i32
      %c0_i32_12 = arith.constant 0 : i32
      %c0_i32_13 = arith.constant 0 : i32
      %c0_i32_14 = arith.constant 0 : i32
      %c0_i32_15 = arith.constant 0 : i32
      %20 = tpu.memref_slice %arg1[%c0_i32_14, %c0_i32_15] : memref<64x128xf32, #tpu.memory_space<any>> -> memref<64x128xf32, #tpu.memory_space<any>>
      %c0_i32_16 = arith.constant 0 : i32
      %c0_i32_17 = arith.constant 0 : i32
      %21 = tpu.memref_slice %arg14[%c0_i32_11, %c0_i32_16, %c0_i32_17] : memref<2x256x128xf32, #tpu.memory_space<vmem>> -> memref<1x64x128xf32, #tpu.memory_space<vmem>>
      %22 = tpu.memref_squeeze %21 : memref<1x64x128xf32, #tpu.memory_space<vmem>> -> memref<64x128xf32, #tpu.memory_space<vmem>>
      %23 = tpu.memref_slice %arg16[%c0_i32_12, %c0_i32_13] : memref<2x2x!tpu.dma_semaphore, #tpu.memory_space<semaphore_mem>> -> memref<1x1x!tpu.dma_semaphore, #tpu.memory_space<semaphore_mem>>
      %24 = tpu.memref_squeeze %23 : memref<1x1x!tpu.dma_semaphore, #tpu.memory_space<semaphore_mem>> -> memref<!tpu.dma_semaphore, #tpu.memory_space<semaphore_mem>>
      tpu.enqueue_dma source(%20 : memref<64x128xf32, #tpu.memory_space<any>>) target(%22 : memref<64x128xf32, #tpu.memory_space<vmem>>) target_semaphore(%24 : memref<!tpu.dma_semaphore, #tpu.memory_space<semaphore_mem>>)
      %c0_i32_18 = arith.constant 0 : i32
      %c1_i32_19 = arith.constant 1 : i32
      %c0_i32_20 = arith.constant 0 : i32
      %c0_i32_21 = arith.constant 0 : i32
      %c0_i32_22 = arith.constant 0 : i32
      %25 = tpu.memref_slice %arg7[%c0_i32_21, %c0_i32_22] : memref<64x128xf32, #tpu.memory_space<any>> -> memref<64x128xf32, #tpu.memory_space<any>>
      %c0_i32_23 = arith.constant 0 : i32
      %c0_i32_24 = arith.constant 0 : i32
      %26 = tpu.memref_slice %arg15[%c0_i32_18, %c0_i32_23, %c0_i32_24] : memref<2x256x128xf32, #tpu.memory_space<vmem>> -> memref<1x64x128xf32, #tpu.memory_space<vmem>>
      %27 = tpu.memref_squeeze %26 : memref<1x64x128xf32, #tpu.memory_space<vmem>> -> memref<64x128xf32, #tpu.memory_space<vmem>>
      %28 = tpu.memref_slice %arg16[%c1_i32_19, %c0_i32_20] : memref<2x2x!tpu.dma_semaphore, #tpu.memory_space<semaphore_mem>> -> memref<1x1x!tpu.dma_semaphore, #tpu.memory_space<semaphore_mem>>
      %29 = tpu.memref_squeeze %28 : memref<1x1x!tpu.dma_semaphore, #tpu.memory_space<semaphore_mem>> -> memref<!tpu.dma_semaphore, #tpu.memory_space<semaphore_mem>>
      tpu.enqueue_dma source(%25 : memref<64x128xf32, #tpu.memory_space<any>>) target(%27 : memref<64x128xf32, #tpu.memory_space<vmem>>) target_semaphore(%29 : memref<!tpu.dma_semaphore, #tpu.memory_space<semaphore_mem>>)
      %c0_i32_25 = arith.constant 0 : i32
      %c0_i32_26 = arith.constant 0 : i32
      %c0_i32_27 = arith.constant 0 : i32
      %c0_i32_28 = arith.constant 0 : i32
      %c0_i32_29 = arith.constant 0 : i32
      %30 = tpu.memref_slice %arg1[%c0_i32_28, %c0_i32_29] : memref<64x128xf32, #tpu.memory_space<any>> -> memref<64x128xf32, #tpu.memory_space<any>>
      %c0_i32_30 = arith.constant 0 : i32
      %c0_i32_31 = arith.constant 0 : i32
      %31 = tpu.memref_slice %arg14[%c0_i32_25, %c0_i32_30, %c0_i32_31] : memref<2x256x128xf32, #tpu.memory_space<vmem>> -> memref<1x64x128xf32, #tpu.memory_space<vmem>>
      %32 = tpu.memref_squeeze %31 : memref<1x64x128xf32, #tpu.memory_space<vmem>> -> memref<64x128xf32, #tpu.memory_space<vmem>>
      %33 = tpu.memref_slice %arg16[%c0_i32_26, %c0_i32_27] : memref<2x2x!tpu.dma_semaphore, #tpu.memory_space<semaphore_mem>> -> memref<1x1x!tpu.dma_semaphore, #tpu.memory_space<semaphore_mem>>
      %34 = tpu.memref_squeeze %33 : memref<1x1x!tpu.dma_semaphore, #tpu.memory_space<semaphore_mem>> -> memref<!tpu.dma_semaphore, #tpu.memory_space<semaphore_mem>>
      tpu.wait_dma2 semaphore(%34 : memref<!tpu.dma_semaphore, #tpu.memory_space<semaphore_mem>>) src(%30 : memref<64x128xf32, #tpu.memory_space<any>>) dst(%32 : memref<64x128xf32, #tpu.memory_space<vmem>>)
      %c0_i32_32 = arith.constant 0 : i32
      %c1_i32_33 = arith.constant 1 : i32
      %c0_i32_34 = arith.constant 0 : i32
      %c0_i32_35 = arith.constant 0 : i32
      %c0_i32_36 = arith.constant 0 : i32
      %35 = tpu.memref_slice %arg7[%c0_i32_35, %c0_i32_36] : memref<64x128xf32, #tpu.memory_space<any>> -> memref<64x128xf32, #tpu.memory_space<any>>
      %c0_i32_37 = arith.constant 0 : i32
      %c0_i32_38 = arith.constant 0 : i32
      %36 = tpu.memref_slice %arg15[%c0_i32_32, %c0_i32_37, %c0_i32_38] : memref<2x256x128xf32, #tpu.memory_space<vmem>> -> memref<1x64x128xf32, #tpu.memory_space<vmem>>
      %37 = tpu.memref_squeeze %36 : memref<1x64x128xf32, #tpu.memory_space<vmem>> -> memref<64x128xf32, #tpu.memory_space<vmem>>
      %38 = tpu.memref_slice %arg16[%c1_i32_33, %c0_i32_34] : memref<2x2x!tpu.dma_semaphore, #tpu.memory_space<semaphore_mem>> -> memref<1x1x!tpu.dma_semaphore, #tpu.memory_space<semaphore_mem>>
      %39 = tpu.memref_squeeze %38 : memref<1x1x!tpu.dma_semaphore, #tpu.memory_space<semaphore_mem>> -> memref<!tpu.dma_semaphore, #tpu.memory_space<semaphore_mem>>
      tpu.wait_dma2 semaphore(%39 : memref<!tpu.dma_semaphore, #tpu.memory_space<semaphore_mem>>) src(%35 : memref<64x128xf32, #tpu.memory_space<any>>) dst(%37 : memref<64x128xf32, #tpu.memory_space<vmem>>)
      %c0_39 = arith.constant 0 : index
      %c0_40 = arith.constant 0 : index
      %c0_41 = arith.constant 0 : index
      %40 = vector.load %arg14[%c0_39, %c0_40, %c0_41] : memref<2x256x128xf32, #tpu.memory_space<vmem>>, vector<1x64x128xf32>
      %41 = vector.shape_cast %40 : vector<1x64x128xf32> to vector<64x128xf32>
      %c0_42 = arith.constant 0 : index
      %c0_43 = arith.constant 0 : index
      %c0_44 = arith.constant 0 : index
      %42 = vector.load %arg15[%c0_42, %c0_43, %c0_44] : memref<2x256x128xf32, #tpu.memory_space<vmem>>, vector<1x64x128xf32>
      %43 = vector.shape_cast %42 : vector<1x64x128xf32> to vector<64x128xf32>
      %44 = arith.subf %41, %43 : vector<64x128xf32>
      %45 = math.absf %44 : vector<64x128xf32>
      %c0_45 = arith.constant 0 : index
      %c0_46 = arith.constant 0 : index
      %46 = vector.load %arg13[%c0_45, %c0_46] : memref<8x128xf32, #tpu.memory_space<vmem>>, vector<8x128xf32>
      %47 = vector.shape_cast %45 : vector<64x128xf32> to vector<8x8x128xf32>
      %cst_47 = arith.constant dense<0.000000e+00> : vector<8x128xf32>
      %48 = vector.multi_reduction <add>, %47, %cst_47 [0] : vector<8x8x128xf32> to vector<8x128xf32>
      %cst_48 = arith.constant 1.22070313E-4 : f32
      %49 = vector.broadcast %cst_48 : f32 to vector<8x128xf32>
      %50 = arith.mulf %49, %48 : vector<8x128xf32>
      %51 = arith.addf %46, %50 : vector<8x128xf32>
      %c0_49 = arith.constant 0 : index
      %c0_50 = arith.constant 0 : index
      %52 = vector.load %arg13[%c0_49, %c0_50] : memref<8x128xf32, #tpu.memory_space<vmem>>, vector<8x128xf32>
      tpu.vector_store %arg13[%c0_49, %c0_50], %51 {strides = array<i32>} : memref<8x128xf32, #tpu.memory_space<vmem>>, vector<8x128xf32>,
    } else {
    }
    %c0_i32_2 = arith.constant 0 : i32
    %5 = arith.cmpi eq, %arg0, %c0_i32_2 : i32
    %6 = arith.extui %5 : i1 to i32
    %c0_i32_3 = arith.constant 0 : i32
    %7 = arith.cmpi ne, %6, %c0_i32_3 : i32
    scf.if %7 {
      %c0_i32_11 = arith.constant 0 : i32
      %c0_i32_12 = arith.constant 0 : i32
      %c0_i32_13 = arith.constant 0 : i32
      %c0_i32_14 = arith.constant 0 : i32
      %c0_i32_15 = arith.constant 0 : i32
      %20 = tpu.memref_slice %arg2[%c0_i32_14, %c0_i32_15] : memref<128x128xf32, #tpu.memory_space<any>> -> memref<128x128xf32, #tpu.memory_space<any>>
      %c0_i32_16 = arith.constant 0 : i32
      %c0_i32_17 = arith.constant 0 : i32
      %21 = tpu.memref_slice %arg14[%c0_i32_11, %c0_i32_16, %c0_i32_17] : memref<2x256x128xf32, #tpu.memory_space<vmem>> -> memref<1x128x128xf32, #tpu.memory_space<vmem>>
      %22 = tpu.memref_squeeze %21 : memref<1x128x128xf32, #tpu.memory_space<vmem>> -> memref<128x128xf32, #tpu.memory_space<vmem>>
      %23 = tpu.memref_slice %arg16[%c0_i32_12, %c0_i32_13] : memref<2x2x!tpu.dma_semaphore, #tpu.memory_space<semaphore_mem>> -> memref<1x1x!tpu.dma_semaphore, #tpu.memory_space<semaphore_mem>>
      %24 = tpu.memref_squeeze %23 : memref<1x1x!tpu.dma_semaphore, #tpu.memory_space<semaphore_mem>> -> memref<!tpu.dma_semaphore, #tpu.memory_space<semaphore_mem>>
      tpu.enqueue_dma source(%20 : memref<128x128xf32, #tpu.memory_space<any>>) target(%22 : memref<128x128xf32, #tpu.memory_space<vmem>>) target_semaphore(%24 : memref<!tpu.dma_semaphore, #tpu.memory_space<semaphore_mem>>)
      %c0_i32_18 = arith.constant 0 : i32
      %c1_i32_19 = arith.constant 1 : i32
      %c0_i32_20 = arith.constant 0 : i32
      %c0_i32_21 = arith.constant 0 : i32
      %c0_i32_22 = arith.constant 0 : i32
      %25 = tpu.memref_slice %arg8[%c0_i32_21, %c0_i32_22] : memref<128x128xf32, #tpu.memory_space<any>> -> memref<128x128xf32, #tpu.memory_space<any>>
      %c0_i32_23 = arith.constant 0 : i32
      %c0_i32_24 = arith.constant 0 : i32
      %26 = tpu.memref_slice %arg15[%c0_i32_18, %c0_i32_23, %c0_i32_24] : memref<2x256x128xf32, #tpu.memory_space<vmem>> -> memref<1x128x128xf32, #tpu.memory_space<vmem>>
      %27 = tpu.memref_squeeze %26 : memref<1x128x128xf32, #tpu.memory_space<vmem>> -> memref<128x128xf32, #tpu.memory_space<vmem>>
      %28 = tpu.memref_slice %arg16[%c1_i32_19, %c0_i32_20] : memref<2x2x!tpu.dma_semaphore, #tpu.memory_space<semaphore_mem>> -> memref<1x1x!tpu.dma_semaphore, #tpu.memory_space<semaphore_mem>>
      %29 = tpu.memref_squeeze %28 : memref<1x1x!tpu.dma_semaphore, #tpu.memory_space<semaphore_mem>> -> memref<!tpu.dma_semaphore, #tpu.memory_space<semaphore_mem>>
      tpu.enqueue_dma source(%25 : memref<128x128xf32, #tpu.memory_space<any>>) target(%27 : memref<128x128xf32, #tpu.memory_space<vmem>>) target_semaphore(%29 : memref<!tpu.dma_semaphore, #tpu.memory_space<semaphore_mem>>)
      %c0_i32_25 = arith.constant 0 : i32
      %c0_i32_26 = arith.constant 0 : i32
      %c0_i32_27 = arith.constant 0 : i32
      %c0_i32_28 = arith.constant 0 : i32
      %c0_i32_29 = arith.constant 0 : i32
      %30 = tpu.memref_slice %arg2[%c0_i32_28, %c0_i32_29] : memref<128x128xf32, #tpu.memory_space<any>> -> memref<128x128xf32, #tpu.memory_space<any>>
      %c0_i32_30 = arith.constant 0 : i32
      %c0_i32_31 = arith.constant 0 : i32
      %31 = tpu.memref_slice %arg14[%c0_i32_25, %c0_i32_30, %c0_i32_31] : memref<2x256x128xf32, #tpu.memory_space<vmem>> -> memref<1x128x128xf32, #tpu.memory_space<vmem>>
      %32 = tpu.memref_squeeze %31 : memref<1x128x128xf32, #tpu.memory_space<vmem>> -> memref<128x128xf32, #tpu.memory_space<vmem>>
      %33 = tpu.memref_slice %arg16[%c0_i32_26, %c0_i32_27] : memref<2x2x!tpu.dma_semaphore, #tpu.memory_space<semaphore_mem>> -> memref<1x1x!tpu.dma_semaphore, #tpu.memory_space<semaphore_mem>>
      %34 = tpu.memref_squeeze %33 : memref<1x1x!tpu.dma_semaphore, #tpu.memory_space<semaphore_mem>> -> memref<!tpu.dma_semaphore, #tpu.memory_space<semaphore_mem>>
      tpu.wait_dma2 semaphore(%34 : memref<!tpu.dma_semaphore, #tpu.memory_space<semaphore_mem>>) src(%30 : memref<128x128xf32, #tpu.memory_space<any>>) dst(%32 : memref<128x128xf32, #tpu.memory_space<vmem>>)
      %c0_i32_32 = arith.constant 0 : i32
      %c1_i32_33 = arith.constant 1 : i32
      %c0_i32_34 = arith.constant 0 : i32
      %c0_i32_35 = arith.constant 0 : i32
      %c0_i32_36 = arith.constant 0 : i32
      %35 = tpu.memref_slice %arg8[%c0_i32_35, %c0_i32_36] : memref<128x128xf32, #tpu.memory_space<any>> -> memref<128x128xf32, #tpu.memory_space<any>>
      %c0_i32_37 = arith.constant 0 : i32
      %c0_i32_38 = arith.constant 0 : i32
      %36 = tpu.memref_slice %arg15[%c0_i32_32, %c0_i32_37, %c0_i32_38] : memref<2x256x128xf32, #tpu.memory_space<vmem>> -> memref<1x128x128xf32, #tpu.memory_space<vmem>>
      %37 = tpu.memref_squeeze %36 : memref<1x128x128xf32, #tpu.memory_space<vmem>> -> memref<128x128xf32, #tpu.memory_space<vmem>>
      %38 = tpu.memref_slice %arg16[%c1_i32_33, %c0_i32_34] : memref<2x2x!tpu.dma_semaphore, #tpu.memory_space<semaphore_mem>> -> memref<1x1x!tpu.dma_semaphore, #tpu.memory_space<semaphore_mem>>
      %39 = tpu.memref_squeeze %38 : memref<1x1x!tpu.dma_semaphore, #tpu.memory_space<semaphore_mem>> -> memref<!tpu.dma_semaphore, #tpu.memory_space<semaphore_mem>>
      tpu.wait_dma2 semaphore(%39 : memref<!tpu.dma_semaphore, #tpu.memory_space<semaphore_mem>>) src(%35 : memref<128x128xf32, #tpu.memory_space<any>>) dst(%37 : memref<128x128xf32, #tpu.memory_space<vmem>>)
      %c0_39 = arith.constant 0 : index
      %c0_40 = arith.constant 0 : index
      %c0_41 = arith.constant 0 : index
      %40 = vector.load %arg14[%c0_39, %c0_40, %c0_41] : memref<2x256x128xf32, #tpu.memory_space<vmem>>, vector<1x128x128xf32>
      %41 = vector.shape_cast %40 : vector<1x128x128xf32> to vector<128x128xf32>
      %c0_42 = arith.constant 0 : index
      %c0_43 = arith.constant 0 : index
      %c0_44 = arith.constant 0 : index
      %42 = vector.load %arg15[%c0_42, %c0_43, %c0_44] : memref<2x256x128xf32, #tpu.memory_space<vmem>>, vector<1x128x128xf32>
      %43 = vector.shape_cast %42 : vector<1x128x128xf32> to vector<128x128xf32>
      %44 = arith.subf %41, %43 : vector<128x128xf32>
      %45 = math.absf %44 : vector<128x128xf32>
      %c0_45 = arith.constant 0 : index
      %c0_46 = arith.constant 0 : index
      %46 = vector.load %arg13[%c0_45, %c0_46] : memref<8x128xf32, #tpu.memory_space<vmem>>, vector<8x128xf32>
      %47 = vector.shape_cast %45 : vector<128x128xf32> to vector<16x8x128xf32>
      %cst_47 = arith.constant dense<0.000000e+00> : vector<8x128xf32>
      %48 = vector.multi_reduction <add>, %47, %cst_47 [0] : vector<16x8x128xf32> to vector<8x128xf32>
      %cst_48 = arith.constant 6.10351563E-5 : f32
      %49 = vector.broadcast %cst_48 : f32 to vector<8x128xf32>
      %50 = arith.mulf %49, %48 : vector<8x128xf32>
      %51 = arith.addf %46, %50 : vector<8x128xf32>
      %c0_49 = arith.constant 0 : index
      %c0_50 = arith.constant 0 : index
      %52 = vector.load %arg13[%c0_49, %c0_50] : memref<8x128xf32, #tpu.memory_space<vmem>>, vector<8x128xf32>
      tpu.vector_store %arg13[%c0_49, %c0_50], %51 {strides = array<i32>} : memref<8x128xf32, #tpu.memory_space<vmem>>, vector<8x128xf32>,
    } else {
    }
    %c0_i32_4 = arith.constant 0 : i32
    %8 = arith.cmpi eq, %arg0, %c0_i32_4 : i32
    %9 = arith.extui %8 : i1 to i32
    %c0_i32_5 = arith.constant 0 : i32
    %10 = arith.cmpi ne, %9, %c0_i32_5 : i32
    scf.if %10 {
      %c0_i32_11 = arith.constant 0 : i32
      %c0_i32_12 = arith.constant 0 : i32
      %c0_i32_13 = arith.constant 0 : i32
      %c0_i32_14 = arith.constant 0 : i32
      %c0_i32_15 = arith.constant 0 : i32
      %20 = tpu.memref_slice %arg3[%c0_i32_14, %c0_i32_15] : memref<256x128xf32, #tpu.memory_space<any>> -> memref<256x128xf32, #tpu.memory_space<any>>
      %c0_i32_16 = arith.constant 0 : i32
      %c0_i32_17 = arith.constant 0 : i32
      %21 = tpu.memref_slice %arg14[%c0_i32_11, %c0_i32_16, %c0_i32_17] : memref<2x256x128xf32, #tpu.memory_space<vmem>> -> memref<1x256x128xf32, #tpu.memory_space<vmem>>
      %22 = tpu.memref_squeeze %21 : memref<1x256x128xf32, #tpu.memory_space<vmem>> -> memref<256x128xf32, #tpu.memory_space<vmem>>
      %23 = tpu.memref_slice %arg16[%c0_i32_12, %c0_i32_13] : memref<2x2x!tpu.dma_semaphore, #tpu.memory_space<semaphore_mem>> -> memref<1x1x!tpu.dma_semaphore, #tpu.memory_space<semaphore_mem>>
      %24 = tpu.memref_squeeze %23 : memref<1x1x!tpu.dma_semaphore, #tpu.memory_space<semaphore_mem>> -> memref<!tpu.dma_semaphore, #tpu.memory_space<semaphore_mem>>
      tpu.enqueue_dma source(%20 : memref<256x128xf32, #tpu.memory_space<any>>) target(%22 : memref<256x128xf32, #tpu.memory_space<vmem>>) target_semaphore(%24 : memref<!tpu.dma_semaphore, #tpu.memory_space<semaphore_mem>>)
      %c0_i32_18 = arith.constant 0 : i32
      %c1_i32_19 = arith.constant 1 : i32
      %c0_i32_20 = arith.constant 0 : i32
      %c0_i32_21 = arith.constant 0 : i32
      %c0_i32_22 = arith.constant 0 : i32
      %25 = tpu.memref_slice %arg9[%c0_i32_21, %c0_i32_22] : memref<256x128xf32, #tpu.memory_space<any>> -> memref<256x128xf32, #tpu.memory_space<any>>
      %c0_i32_23 = arith.constant 0 : i32
      %c0_i32_24 = arith.constant 0 : i32
      %26 = tpu.memref_slice %arg15[%c0_i32_18, %c0_i32_23, %c0_i32_24] : memref<2x256x128xf32, #tpu.memory_space<vmem>> -> memref<1x256x128xf32, #tpu.memory_space<vmem>>
      %27 = tpu.memref_squeeze %26 : memref<1x256x128xf32, #tpu.memory_space<vmem>> -> memref<256x128xf32, #tpu.memory_space<vmem>>
      %28 = tpu.memref_slice %arg16[%c1_i32_19, %c0_i32_20] : memref<2x2x!tpu.dma_semaphore, #tpu.memory_space<semaphore_mem>> -> memref<1x1x!tpu.dma_semaphore, #tpu.memory_space<semaphore_mem>>
      %29 = tpu.memref_squeeze %28 : memref<1x1x!tpu.dma_semaphore, #tpu.memory_space<semaphore_mem>> -> memref<!tpu.dma_semaphore, #tpu.memory_space<semaphore_mem>>
      tpu.enqueue_dma source(%25 : memref<256x128xf32, #tpu.memory_space<any>>) target(%27 : memref<256x128xf32, #tpu.memory_space<vmem>>) target_semaphore(%29 : memref<!tpu.dma_semaphore, #tpu.memory_space<semaphore_mem>>)
      %c0_i32_25 = arith.constant 0 : i32
      %c0_i32_26 = arith.constant 0 : i32
      %c0_i32_27 = arith.constant 0 : i32
      %c0_i32_28 = arith.constant 0 : i32
      %c0_i32_29 = arith.constant 0 : i32
      %30 = tpu.memref_slice %arg3[%c0_i32_28, %c0_i32_29] : memref<256x128xf32, #tpu.memory_space<any>> -> memref<256x128xf32, #tpu.memory_space<any>>
      %c0_i32_30 = arith.constant 0 : i32
      %c0_i32_31 = arith.constant 0 : i32
      %31 = tpu.memref_slice %arg14[%c0_i32_25, %c0_i32_30, %c0_i32_31] : memref<2x256x128xf32, #tpu.memory_space<vmem>> -> memref<1x256x128xf32, #tpu.memory_space<vmem>>
      %32 = tpu.memref_squeeze %31 : memref<1x256x128xf32, #tpu.memory_space<vmem>> -> memref<256x128xf32, #tpu.memory_space<vmem>>
      %33 = tpu.memref_slice %arg16[%c0_i32_26, %c0_i32_27] : memref<2x2x!tpu.dma_semaphore, #tpu.memory_space<semaphore_mem>> -> memref<1x1x!tpu.dma_semaphore, #tpu.memory_space<semaphore_mem>>
      %34 = tpu.memref_squeeze %33 : memref<1x1x!tpu.dma_semaphore, #tpu.memory_space<semaphore_mem>> -> memref<!tpu.dma_semaphore, #tpu.memory_space<semaphore_mem>>
      tpu.wait_dma2 semaphore(%34 : memref<!tpu.dma_semaphore, #tpu.memory_space<semaphore_mem>>) src(%30 : memref<256x128xf32, #tpu.memory_space<any>>) dst(%32 : memref<256x128xf32, #tpu.memory_space<vmem>>)
      %c0_i32_32 = arith.constant 0 : i32
      %c1_i32_33 = arith.constant 1 : i32
      %c0_i32_34 = arith.constant 0 : i32
      %c0_i32_35 = arith.constant 0 : i32
      %c0_i32_36 = arith.constant 0 : i32
      %35 = tpu.memref_slice %arg9[%c0_i32_35, %c0_i32_36] : memref<256x128xf32, #tpu.memory_space<any>> -> memref<256x128xf32, #tpu.memory_space<any>>
      %c0_i32_37 = arith.constant 0 : i32
      %c0_i32_38 = arith.constant 0 : i32
      %36 = tpu.memref_slice %arg15[%c0_i32_32, %c0_i32_37, %c0_i32_38] : memref<2x256x128xf32, #tpu.memory_space<vmem>> -> memref<1x256x128xf32, #tpu.memory_space<vmem>>
      %37 = tpu.memref_squeeze %36 : memref<1x256x128xf32, #tpu.memory_space<vmem>> -> memref<256x128xf32, #tpu.memory_space<vmem>>
      %38 = tpu.memref_slice %arg16[%c1_i32_33, %c0_i32_34] : memref<2x2x!tpu.dma_semaphore, #tpu.memory_space<semaphore_mem>> -> memref<1x1x!tpu.dma_semaphore, #tpu.memory_space<semaphore_mem>>
      %39 = tpu.memref_squeeze %38 : memref<1x1x!tpu.dma_semaphore, #tpu.memory_space<semaphore_mem>> -> memref<!tpu.dma_semaphore, #tpu.memory_space<semaphore_mem>>
      tpu.wait_dma2 semaphore(%39 : memref<!tpu.dma_semaphore, #tpu.memory_space<semaphore_mem>>) src(%35 : memref<256x128xf32, #tpu.memory_space<any>>) dst(%37 : memref<256x128xf32, #tpu.memory_space<vmem>>)
      %c0_39 = arith.constant 0 : index
      %c0_40 = arith.constant 0 : index
      %c0_41 = arith.constant 0 : index
      %40 = vector.load %arg14[%c0_39, %c0_40, %c0_41] : memref<2x256x128xf32, #tpu.memory_space<vmem>>, vector<1x256x128xf32>
      %41 = vector.shape_cast %40 : vector<1x256x128xf32> to vector<256x128xf32>
      %c0_42 = arith.constant 0 : index
      %c0_43 = arith.constant 0 : index
      %c0_44 = arith.constant 0 : index
      %42 = vector.load %arg15[%c0_42, %c0_43, %c0_44] : memref<2x256x128xf32, #tpu.memory_space<vmem>>, vector<1x256x128xf32>
      %43 = vector.shape_cast %42 : vector<1x256x128xf32> to vector<256x128xf32>
      %44 = arith.subf %41, %43 : vector<256x128xf32>
      %45 = math.absf %44 : vector<256x128xf32>
      %c0_45 = arith.constant 0 : index
      %c0_46 = arith.constant 0 : index
      %46 = vector.load %arg13[%c0_45, %c0_46] : memref<8x128xf32, #tpu.memory_space<vmem>>, vector<8x128xf32>
      %47 = vector.shape_cast %45 : vector<256x128xf32> to vector<32x8x128xf32>
      %cst_47 = arith.constant dense<0.000000e+00> : vector<8x128xf32>
      %48 = vector.multi_reduction <add>, %47, %cst_47 [0] : vector<32x8x128xf32> to vector<8x128xf32>
      %cst_48 = arith.constant 3.05175781E-5 : f32
      %49 = vector.broadcast %cst_48 : f32 to vector<8x128xf32>
      %50 = arith.mulf %49, %48 : vector<8x128xf32>
      %51 = arith.addf %46, %50 : vector<8x128xf32>
      %c0_49 = arith.constant 0 : index
      %c0_50 = arith.constant 0 : index
      %52 = vector.load %arg13[%c0_49, %c0_50] : memref<8x128xf32, #tpu.memory_space<vmem>>, vector<8x128xf32>
      tpu.vector_store %arg13[%c0_49, %c0_50], %51 {strides = array<i32>} : memref<8x128xf32, #tpu.memory_space<vmem>>, vector<8x128xf32>,
    } else {
    }
    %c1_i32 = arith.constant 1 : i32
    %11 = arith.cmpi eq, %arg0, %c1_i32 : i32
    %12 = arith.extui %11 : i1 to i32
    %c0_i32_6 = arith.constant 0 : i32
    %13 = arith.cmpi ne, %12, %c0_i32_6 : i32
    scf.if %13 {
      %c0_i32_11 = arith.constant 0 : i32
      %c0_i32_12 = arith.constant 0 : i32
      %c0_i32_13 = arith.constant 0 : i32
      %c0_i32_14 = arith.constant 0 : i32
      %c0_i32_15 = arith.constant 0 : i32
      %20 = tpu.memref_slice %arg4[%c0_i32_14, %c0_i32_15] : memref<256x128xf32, #tpu.memory_space<any>> -> memref<256x128xf32, #tpu.memory_space<any>>
      %c0_i32_16 = arith.constant 0 : i32
      %c0_i32_17 = arith.constant 0 : i32
      %21 = tpu.memref_slice %arg14[%c0_i32_11, %c0_i32_16, %c0_i32_17] : memref<2x256x128xf32, #tpu.memory_space<vmem>> -> memref<1x256x128xf32, #tpu.memory_space<vmem>>
      %22 = tpu.memref_squeeze %21 : memref<1x256x128xf32, #tpu.memory_space<vmem>> -> memref<256x128xf32, #tpu.memory_space<vmem>>
      %23 = tpu.memref_slice %arg16[%c0_i32_12, %c0_i32_13] : memref<2x2x!tpu.dma_semaphore, #tpu.memory_space<semaphore_mem>> -> memref<1x1x!tpu.dma_semaphore, #tpu.memory_space<semaphore_mem>>
      %24 = tpu.memref_squeeze %23 : memref<1x1x!tpu.dma_semaphore, #tpu.memory_space<semaphore_mem>> -> memref<!tpu.dma_semaphore, #tpu.memory_space<semaphore_mem>>
      tpu.enqueue_dma source(%20 : memref<256x128xf32, #tpu.memory_space<any>>) target(%22 : memref<256x128xf32, #tpu.memory_space<vmem>>) target_semaphore(%24 : memref<!tpu.dma_semaphore, #tpu.memory_space<semaphore_mem>>)
      %c0_i32_18 = arith.constant 0 : i32
      %c1_i32_19 = arith.constant 1 : i32
      %c0_i32_20 = arith.constant 0 : i32
      %c0_i32_21 = arith.constant 0 : i32
      %c0_i32_22 = arith.constant 0 : i32
      %25 = tpu.memref_slice %arg10[%c0_i32_21, %c0_i32_22] : memref<256x128xf32, #tpu.memory_space<any>> -> memref<256x128xf32, #tpu.memory_space<any>>
      %c0_i32_23 = arith.constant 0 : i32
      %c0_i32_24 = arith.constant 0 : i32
      %26 = tpu.memref_slice %arg15[%c0_i32_18, %c0_i32_23, %c0_i32_24] : memref<2x256x128xf32, #tpu.memory_space<vmem>> -> memref<1x256x128xf32, #tpu.memory_space<vmem>>
      %27 = tpu.memref_squeeze %26 : memref<1x256x128xf32, #tpu.memory_space<vmem>> -> memref<256x128xf32, #tpu.memory_space<vmem>>
      %28 = tpu.memref_slice %arg16[%c1_i32_19, %c0_i32_20] : memref<2x2x!tpu.dma_semaphore, #tpu.memory_space<semaphore_mem>> -> memref<1x1x!tpu.dma_semaphore, #tpu.memory_space<semaphore_mem>>
      %29 = tpu.memref_squeeze %28 : memref<1x1x!tpu.dma_semaphore, #tpu.memory_space<semaphore_mem>> -> memref<!tpu.dma_semaphore, #tpu.memory_space<semaphore_mem>>
      tpu.enqueue_dma source(%25 : memref<256x128xf32, #tpu.memory_space<any>>) target(%27 : memref<256x128xf32, #tpu.memory_space<vmem>>) target_semaphore(%29 : memref<!tpu.dma_semaphore, #tpu.memory_space<semaphore_mem>>)
      %c0_i32_25 = arith.constant 0 : i32
      %c0_i32_26 = arith.constant 0 : i32
      %c0_i32_27 = arith.constant 0 : i32
      %c0_i32_28 = arith.constant 0 : i32
      %c0_i32_29 = arith.constant 0 : i32
      %30 = tpu.memref_slice %arg4[%c0_i32_28, %c0_i32_29] : memref<256x128xf32, #tpu.memory_space<any>> -> memref<256x128xf32, #tpu.memory_space<any>>
      %c0_i32_30 = arith.constant 0 : i32
      %c0_i32_31 = arith.constant 0 : i32
      %31 = tpu.memref_slice %arg14[%c0_i32_25, %c0_i32_30, %c0_i32_31] : memref<2x256x128xf32, #tpu.memory_space<vmem>> -> memref<1x256x128xf32, #tpu.memory_space<vmem>>
      %32 = tpu.memref_squeeze %31 : memref<1x256x128xf32, #tpu.memory_space<vmem>> -> memref<256x128xf32, #tpu.memory_space<vmem>>
      %33 = tpu.memref_slice %arg16[%c0_i32_26, %c0_i32_27] : memref<2x2x!tpu.dma_semaphore, #tpu.memory_space<semaphore_mem>> -> memref<1x1x!tpu.dma_semaphore, #tpu.memory_space<semaphore_mem>>
      %34 = tpu.memref_squeeze %33 : memref<1x1x!tpu.dma_semaphore, #tpu.memory_space<semaphore_mem>> -> memref<!tpu.dma_semaphore, #tpu.memory_space<semaphore_mem>>
      tpu.wait_dma2 semaphore(%34 : memref<!tpu.dma_semaphore, #tpu.memory_space<semaphore_mem>>) src(%30 : memref<256x128xf32, #tpu.memory_space<any>>) dst(%32 : memref<256x128xf32, #tpu.memory_space<vmem>>)
      %c0_i32_32 = arith.constant 0 : i32
      %c1_i32_33 = arith.constant 1 : i32
      %c0_i32_34 = arith.constant 0 : i32
      %c0_i32_35 = arith.constant 0 : i32
      %c0_i32_36 = arith.constant 0 : i32
      %35 = tpu.memref_slice %arg10[%c0_i32_35, %c0_i32_36] : memref<256x128xf32, #tpu.memory_space<any>> -> memref<256x128xf32, #tpu.memory_space<any>>
      %c0_i32_37 = arith.constant 0 : i32
      %c0_i32_38 = arith.constant 0 : i32
      %36 = tpu.memref_slice %arg15[%c0_i32_32, %c0_i32_37, %c0_i32_38] : memref<2x256x128xf32, #tpu.memory_space<vmem>> -> memref<1x256x128xf32, #tpu.memory_space<vmem>>
      %37 = tpu.memref_squeeze %36 : memref<1x256x128xf32, #tpu.memory_space<vmem>> -> memref<256x128xf32, #tpu.memory_space<vmem>>
      %38 = tpu.memref_slice %arg16[%c1_i32_33, %c0_i32_34] : memref<2x2x!tpu.dma_semaphore, #tpu.memory_space<semaphore_mem>> -> memref<1x1x!tpu.dma_semaphore, #tpu.memory_space<semaphore_mem>>
      %39 = tpu.memref_squeeze %38 : memref<1x1x!tpu.dma_semaphore, #tpu.memory_space<semaphore_mem>> -> memref<!tpu.dma_semaphore, #tpu.memory_space<semaphore_mem>>
      tpu.wait_dma2 semaphore(%39 : memref<!tpu.dma_semaphore, #tpu.memory_space<semaphore_mem>>) src(%35 : memref<256x128xf32, #tpu.memory_space<any>>) dst(%37 : memref<256x128xf32, #tpu.memory_space<vmem>>)
      %c0_39 = arith.constant 0 : index
      %c0_40 = arith.constant 0 : index
      %c0_41 = arith.constant 0 : index
      %40 = vector.load %arg14[%c0_39, %c0_40, %c0_41] : memref<2x256x128xf32, #tpu.memory_space<vmem>>, vector<1x256x128xf32>
      %41 = vector.shape_cast %40 : vector<1x256x128xf32> to vector<256x128xf32>
      %c0_42 = arith.constant 0 : index
      %c0_43 = arith.constant 0 : index
      %c0_44 = arith.constant 0 : index
      %42 = vector.load %arg15[%c0_42, %c0_43, %c0_44] : memref<2x256x128xf32, #tpu.memory_space<vmem>>, vector<1x256x128xf32>
      %43 = vector.shape_cast %42 : vector<1x256x128xf32> to vector<256x128xf32>
      %44 = arith.subf %41, %43 : vector<256x128xf32>
      %45 = math.absf %44 : vector<256x128xf32>
      %c0_45 = arith.constant 0 : index
      %c0_46 = arith.constant 0 : index
      %46 = vector.load %arg13[%c0_45, %c0_46] : memref<8x128xf32, #tpu.memory_space<vmem>>, vector<8x128xf32>
      %47 = vector.shape_cast %45 : vector<256x128xf32> to vector<32x8x128xf32>
      %cst_47 = arith.constant dense<0.000000e+00> : vector<8x128xf32>
      %48 = vector.multi_reduction <add>, %47, %cst_47 [0] : vector<32x8x128xf32> to vector<8x128xf32>
      %cst_48 = arith.constant 3.05175781E-5 : f32
      %49 = vector.broadcast %cst_48 : f32 to vector<8x128xf32>
      %50 = arith.mulf %49, %48 : vector<8x128xf32>
      %51 = arith.addf %46, %50 : vector<8x128xf32>
      %c0_49 = arith.constant 0 : index
      %c0_50 = arith.constant 0 : index
      %52 = vector.load %arg13[%c0_49, %c0_50] : memref<8x128xf32, #tpu.memory_space<vmem>>, vector<8x128xf32>
      tpu.vector_store %arg13[%c0_49, %c0_50], %51 {strides = array<i32>} : memref<8x128xf32, #tpu.memory_space<vmem>>, vector<8x128xf32>,
    } else {
    }
    %c1_i32_7 = arith.constant 1 : i32
    %14 = arith.cmpi eq, %arg0, %c1_i32_7 : i32
    %15 = arith.extui %14 : i1 to i32
    %c0_i32_8 = arith.constant 0 : i32
    %16 = arith.cmpi ne, %15, %c0_i32_8 : i32
    scf.if %16 {
      %c0_i32_11 = arith.constant 0 : i32
      %c0_i32_12 = arith.constant 0 : i32
      %c0_i32_13 = arith.constant 0 : i32
      %c0_i32_14 = arith.constant 0 : i32
      %c0_i32_15 = arith.constant 0 : i32
      %20 = tpu.memref_slice %arg5[%c0_i32_14, %c0_i32_15] : memref<128x128xf32, #tpu.memory_space<any>> -> memref<128x128xf32, #tpu.memory_space<any>>
      %c0_i32_16 = arith.constant 0 : i32
      %c0_i32_17 = arith.constant 0 : i32
      %21 = tpu.memref_slice %arg14[%c0_i32_11, %c0_i32_16, %c0_i32_17] : memref<2x256x128xf32, #tpu.memory_space<vmem>> -> memref<1x128x128xf32, #tpu.memory_space<vmem>>
      %22 = tpu.memref_squeeze %21 : memref<1x128x128xf32, #tpu.memory_space<vmem>> -> memref<128x128xf32, #tpu.memory_space<vmem>>
      %23 = tpu.memref_slice %arg16[%c0_i32_12, %c0_i32_13] : memref<2x2x!tpu.dma_semaphore, #tpu.memory_space<semaphore_mem>> -> memref<1x1x!tpu.dma_semaphore, #tpu.memory_space<semaphore_mem>>
      %24 = tpu.memref_squeeze %23 : memref<1x1x!tpu.dma_semaphore, #tpu.memory_space<semaphore_mem>> -> memref<!tpu.dma_semaphore, #tpu.memory_space<semaphore_mem>>
      tpu.enqueue_dma source(%20 : memref<128x128xf32, #tpu.memory_space<any>>) target(%22 : memref<128x128xf32, #tpu.memory_space<vmem>>) target_semaphore(%24 : memref<!tpu.dma_semaphore, #tpu.memory_space<semaphore_mem>>)
      %c0_i32_18 = arith.constant 0 : i32
      %c1_i32_19 = arith.constant 1 : i32
      %c0_i32_20 = arith.constant 0 : i32
      %c0_i32_21 = arith.constant 0 : i32
      %c0_i32_22 = arith.constant 0 : i32
      %25 = tpu.memref_slice %arg11[%c0_i32_21, %c0_i32_22] : memref<128x128xf32, #tpu.memory_space<any>> -> memref<128x128xf32, #tpu.memory_space<any>>
      %c0_i32_23 = arith.constant 0 : i32
      %c0_i32_24 = arith.constant 0 : i32
      %26 = tpu.memref_slice %arg15[%c0_i32_18, %c0_i32_23, %c0_i32_24] : memref<2x256x128xf32, #tpu.memory_space<vmem>> -> memref<1x128x128xf32, #tpu.memory_space<vmem>>
      %27 = tpu.memref_squeeze %26 : memref<1x128x128xf32, #tpu.memory_space<vmem>> -> memref<128x128xf32, #tpu.memory_space<vmem>>
      %28 = tpu.memref_slice %arg16[%c1_i32_19, %c0_i32_20] : memref<2x2x!tpu.dma_semaphore, #tpu.memory_space<semaphore_mem>> -> memref<1x1x!tpu.dma_semaphore, #tpu.memory_space<semaphore_mem>>
      %29 = tpu.memref_squeeze %28 : memref<1x1x!tpu.dma_semaphore, #tpu.memory_space<semaphore_mem>> -> memref<!tpu.dma_semaphore, #tpu.memory_space<semaphore_mem>>
      tpu.enqueue_dma source(%25 : memref<128x128xf32, #tpu.memory_space<any>>) target(%27 : memref<128x128xf32, #tpu.memory_space<vmem>>) target_semaphore(%29 : memref<!tpu.dma_semaphore, #tpu.memory_space<semaphore_mem>>)
      %c0_i32_25 = arith.constant 0 : i32
      %c0_i32_26 = arith.constant 0 : i32
      %c0_i32_27 = arith.constant 0 : i32
      %c0_i32_28 = arith.constant 0 : i32
      %c0_i32_29 = arith.constant 0 : i32
      %30 = tpu.memref_slice %arg5[%c0_i32_28, %c0_i32_29] : memref<128x128xf32, #tpu.memory_space<any>> -> memref<128x128xf32, #tpu.memory_space<any>>
      %c0_i32_30 = arith.constant 0 : i32
      %c0_i32_31 = arith.constant 0 : i32
      %31 = tpu.memref_slice %arg14[%c0_i32_25, %c0_i32_30, %c0_i32_31] : memref<2x256x128xf32, #tpu.memory_space<vmem>> -> memref<1x128x128xf32, #tpu.memory_space<vmem>>
      %32 = tpu.memref_squeeze %31 : memref<1x128x128xf32, #tpu.memory_space<vmem>> -> memref<128x128xf32, #tpu.memory_space<vmem>>
      %33 = tpu.memref_slice %arg16[%c0_i32_26, %c0_i32_27] : memref<2x2x!tpu.dma_semaphore, #tpu.memory_space<semaphore_mem>> -> memref<1x1x!tpu.dma_semaphore, #tpu.memory_space<semaphore_mem>>
      %34 = tpu.memref_squeeze %33 : memref<1x1x!tpu.dma_semaphore, #tpu.memory_space<semaphore_mem>> -> memref<!tpu.dma_semaphore, #tpu.memory_space<semaphore_mem>>
      tpu.wait_dma2 semaphore(%34 : memref<!tpu.dma_semaphore, #tpu.memory_space<semaphore_mem>>) src(%30 : memref<128x128xf32, #tpu.memory_space<any>>) dst(%32 : memref<128x128xf32, #tpu.memory_space<vmem>>)
      %c0_i32_32 = arith.constant 0 : i32
      %c1_i32_33 = arith.constant 1 : i32
      %c0_i32_34 = arith.constant 0 : i32
      %c0_i32_35 = arith.constant 0 : i32
      %c0_i32_36 = arith.constant 0 : i32
      %35 = tpu.memref_slice %arg11[%c0_i32_35, %c0_i32_36] : memref<128x128xf32, #tpu.memory_space<any>> -> memref<128x128xf32, #tpu.memory_space<any>>
      %c0_i32_37 = arith.constant 0 : i32
      %c0_i32_38 = arith.constant 0 : i32
      %36 = tpu.memref_slice %arg15[%c0_i32_32, %c0_i32_37, %c0_i32_38] : memref<2x256x128xf32, #tpu.memory_space<vmem>> -> memref<1x128x128xf32, #tpu.memory_space<vmem>>
      %37 = tpu.memref_squeeze %36 : memref<1x128x128xf32, #tpu.memory_space<vmem>> -> memref<128x128xf32, #tpu.memory_space<vmem>>
      %38 = tpu.memref_slice %arg16[%c1_i32_33, %c0_i32_34] : memref<2x2x!tpu.dma_semaphore, #tpu.memory_space<semaphore_mem>> -> memref<1x1x!tpu.dma_semaphore, #tpu.memory_space<semaphore_mem>>
      %39 = tpu.memref_squeeze %38 : memref<1x1x!tpu.dma_semaphore, #tpu.memory_space<semaphore_mem>> -> memref<!tpu.dma_semaphore, #tpu.memory_space<semaphore_mem>>
      tpu.wait_dma2 semaphore(%39 : memref<!tpu.dma_semaphore, #tpu.memory_space<semaphore_mem>>) src(%35 : memref<128x128xf32, #tpu.memory_space<any>>) dst(%37 : memref<128x128xf32, #tpu.memory_space<vmem>>)
      %c0_39 = arith.constant 0 : index
      %c0_40 = arith.constant 0 : index
      %c0_41 = arith.constant 0 : index
      %40 = vector.load %arg14[%c0_39, %c0_40, %c0_41] : memref<2x256x128xf32, #tpu.memory_space<vmem>>, vector<1x128x128xf32>
      %41 = vector.shape_cast %40 : vector<1x128x128xf32> to vector<128x128xf32>
      %c0_42 = arith.constant 0 : index
      %c0_43 = arith.constant 0 : index
      %c0_44 = arith.constant 0 : index
      %42 = vector.load %arg15[%c0_42, %c0_43, %c0_44] : memref<2x256x128xf32, #tpu.memory_space<vmem>>, vector<1x128x128xf32>
      %43 = vector.shape_cast %42 : vector<1x128x128xf32> to vector<128x128xf32>
      %44 = arith.subf %41, %43 : vector<128x128xf32>
      %45 = math.absf %44 : vector<128x128xf32>
      %c0_45 = arith.constant 0 : index
      %c0_46 = arith.constant 0 : index
      %46 = vector.load %arg13[%c0_45, %c0_46] : memref<8x128xf32, #tpu.memory_space<vmem>>, vector<8x128xf32>
      %47 = vector.shape_cast %45 : vector<128x128xf32> to vector<16x8x128xf32>
      %cst_47 = arith.constant dense<0.000000e+00> : vector<8x128xf32>
      %48 = vector.multi_reduction <add>, %47, %cst_47 [0] : vector<16x8x128xf32> to vector<8x128xf32>
      %cst_48 = arith.constant 6.10351563E-5 : f32
      %49 = vector.broadcast %cst_48 : f32 to vector<8x128xf32>
      %50 = arith.mulf %49, %48 : vector<8x128xf32>
      %51 = arith.addf %46, %50 : vector<8x128xf32>
      %c0_49 = arith.constant 0 : index
      %c0_50 = arith.constant 0 : index
      %52 = vector.load %arg13[%c0_49, %c0_50] : memref<8x128xf32, #tpu.memory_space<vmem>>, vector<8x128xf32>
      tpu.vector_store %arg13[%c0_49, %c0_50], %51 {strides = array<i32>} : memref<8x128xf32, #tpu.memory_space<vmem>>, vector<8x128xf32>,
    } else {
    }
    %c1_i32_9 = arith.constant 1 : i32
    %17 = arith.cmpi eq, %arg0, %c1_i32_9 : i32
    %18 = arith.extui %17 : i1 to i32
    %c0_i32_10 = arith.constant 0 : i32
    %19 = arith.cmpi ne, %18, %c0_i32_10 : i32
    scf.if %19 {
      %c0_i32_11 = arith.constant 0 : i32
      %c0_i32_12 = arith.constant 0 : i32
      %c0_i32_13 = arith.constant 0 : i32
      %c0_i32_14 = arith.constant 0 : i32
      %c0_i32_15 = arith.constant 0 : i32
      %20 = tpu.memref_slice %arg6[%c0_i32_14, %c0_i32_15] : memref<64x128xf32, #tpu.memory_space<any>> -> memref<64x128xf32, #tpu.memory_space<any>>
      %c0_i32_16 = arith.constant 0 : i32
      %c0_i32_17 = arith.constant 0 : i32
      %21 = tpu.memref_slice %arg14[%c0_i32_11, %c0_i32_16, %c0_i32_17] : memref<2x256x128xf32, #tpu.memory_space<vmem>> -> memref<1x64x128xf32, #tpu.memory_space<vmem>>
      %22 = tpu.memref_squeeze %21 : memref<1x64x128xf32, #tpu.memory_space<vmem>> -> memref<64x128xf32, #tpu.memory_space<vmem>>
      %23 = tpu.memref_slice %arg16[%c0_i32_12, %c0_i32_13] : memref<2x2x!tpu.dma_semaphore, #tpu.memory_space<semaphore_mem>> -> memref<1x1x!tpu.dma_semaphore, #tpu.memory_space<semaphore_mem>>
      %24 = tpu.memref_squeeze %23 : memref<1x1x!tpu.dma_semaphore, #tpu.memory_space<semaphore_mem>> -> memref<!tpu.dma_semaphore, #tpu.memory_space<semaphore_mem>>
      tpu.enqueue_dma source(%20 : memref<64x128xf32, #tpu.memory_space<any>>) target(%22 : memref<64x128xf32, #tpu.memory_space<vmem>>) target_semaphore(%24 : memref<!tpu.dma_semaphore, #tpu.memory_space<semaphore_mem>>)
      %c0_i32_18 = arith.constant 0 : i32
      %c1_i32_19 = arith.constant 1 : i32
      %c0_i32_20 = arith.constant 0 : i32
      %c0_i32_21 = arith.constant 0 : i32
      %c0_i32_22 = arith.constant 0 : i32
      %25 = tpu.memref_slice %arg12[%c0_i32_21, %c0_i32_22] : memref<64x128xf32, #tpu.memory_space<any>> -> memref<64x128xf32, #tpu.memory_space<any>>
      %c0_i32_23 = arith.constant 0 : i32
      %c0_i32_24 = arith.constant 0 : i32
      %26 = tpu.memref_slice %arg15[%c0_i32_18, %c0_i32_23, %c0_i32_24] : memref<2x256x128xf32, #tpu.memory_space<vmem>> -> memref<1x64x128xf32, #tpu.memory_space<vmem>>
      %27 = tpu.memref_squeeze %26 : memref<1x64x128xf32, #tpu.memory_space<vmem>> -> memref<64x128xf32, #tpu.memory_space<vmem>>
      %28 = tpu.memref_slice %arg16[%c1_i32_19, %c0_i32_20] : memref<2x2x!tpu.dma_semaphore, #tpu.memory_space<semaphore_mem>> -> memref<1x1x!tpu.dma_semaphore, #tpu.memory_space<semaphore_mem>>
      %29 = tpu.memref_squeeze %28 : memref<1x1x!tpu.dma_semaphore, #tpu.memory_space<semaphore_mem>> -> memref<!tpu.dma_semaphore, #tpu.memory_space<semaphore_mem>>
      tpu.enqueue_dma source(%25 : memref<64x128xf32, #tpu.memory_space<any>>) target(%27 : memref<64x128xf32, #tpu.memory_space<vmem>>) target_semaphore(%29 : memref<!tpu.dma_semaphore, #tpu.memory_space<semaphore_mem>>)
      %c0_i32_25 = arith.constant 0 : i32
      %c0_i32_26 = arith.constant 0 : i32
      %c0_i32_27 = arith.constant 0 : i32
      %c0_i32_28 = arith.constant 0 : i32
      %c0_i32_29 = arith.constant 0 : i32
      %30 = tpu.memref_slice %arg6[%c0_i32_28, %c0_i32_29] : memref<64x128xf32, #tpu.memory_space<any>> -> memref<64x128xf32, #tpu.memory_space<any>>
      %c0_i32_30 = arith.constant 0 : i32
      %c0_i32_31 = arith.constant 0 : i32
      %31 = tpu.memref_slice %arg14[%c0_i32_25, %c0_i32_30, %c0_i32_31] : memref<2x256x128xf32, #tpu.memory_space<vmem>> -> memref<1x64x128xf32, #tpu.memory_space<vmem>>
      %32 = tpu.memref_squeeze %31 : memref<1x64x128xf32, #tpu.memory_space<vmem>> -> memref<64x128xf32, #tpu.memory_space<vmem>>
      %33 = tpu.memref_slice %arg16[%c0_i32_26, %c0_i32_27] : memref<2x2x!tpu.dma_semaphore, #tpu.memory_space<semaphore_mem>> -> memref<1x1x!tpu.dma_semaphore, #tpu.memory_space<semaphore_mem>>
      %34 = tpu.memref_squeeze %33 : memref<1x1x!tpu.dma_semaphore, #tpu.memory_space<semaphore_mem>> -> memref<!tpu.dma_semaphore, #tpu.memory_space<semaphore_mem>>
      tpu.wait_dma2 semaphore(%34 : memref<!tpu.dma_semaphore, #tpu.memory_space<semaphore_mem>>) src(%30 : memref<64x128xf32, #tpu.memory_space<any>>) dst(%32 : memref<64x128xf32, #tpu.memory_space<vmem>>)
      %c0_i32_32 = arith.constant 0 : i32
      %c1_i32_33 = arith.constant 1 : i32
      %c0_i32_34 = arith.constant 0 : i32
      %c0_i32_35 = arith.constant 0 : i32
      %c0_i32_36 = arith.constant 0 : i32
      %35 = tpu.memref_slice %arg12[%c0_i32_35, %c0_i32_36] : memref<64x128xf32, #tpu.memory_space<any>> -> memref<64x128xf32, #tpu.memory_space<any>>
      %c0_i32_37 = arith.constant 0 : i32
      %c0_i32_38 = arith.constant 0 : i32
      %36 = tpu.memref_slice %arg15[%c0_i32_32, %c0_i32_37, %c0_i32_38] : memref<2x256x128xf32, #tpu.memory_space<vmem>> -> memref<1x64x128xf32, #tpu.memory_space<vmem>>
      %37 = tpu.memref_squeeze %36 : memref<1x64x128xf32, #tpu.memory_space<vmem>> -> memref<64x128xf32, #tpu.memory_space<vmem>>
      %38 = tpu.memref_slice %arg16[%c1_i32_33, %c0_i32_34] : memref<2x2x!tpu.dma_semaphore, #tpu.memory_space<semaphore_mem>> -> memref<1x1x!tpu.dma_semaphore, #tpu.memory_space<semaphore_mem>>
      %39 = tpu.memref_squeeze %38 : memref<1x1x!tpu.dma_semaphore, #tpu.memory_space<semaphore_mem>> -> memref<!tpu.dma_semaphore, #tpu.memory_space<semaphore_mem>>
      tpu.wait_dma2 semaphore(%39 : memref<!tpu.dma_semaphore, #tpu.memory_space<semaphore_mem>>) src(%35 : memref<64x128xf32, #tpu.memory_space<any>>) dst(%37 : memref<64x128xf32, #tpu.memory_space<vmem>>)
      %c0_39 = arith.constant 0 : index
      %c0_40 = arith.constant 0 : index
      %c0_41 = arith.constant 0 : index
      %40 = vector.load %arg14[%c0_39, %c0_40, %c0_41] : memref<2x256x128xf32, #tpu.memory_space<vmem>>, vector<1x64x128xf32>
      %41 = vector.shape_cast %40 : vector<1x64x128xf32> to vector<64x128xf32>
      %c0_42 = arith.constant 0 : index
      %c0_43 = arith.constant 0 : index
      %c0_44 = arith.constant 0 : index
      %42 = vector.load %arg15[%c0_42, %c0_43, %c0_44] : memref<2x256x128xf32, #tpu.memory_space<vmem>>, vector<1x64x128xf32>
      %43 = vector.shape_cast %42 : vector<1x64x128xf32> to vector<64x128xf32>
      %44 = arith.subf %41, %43 : vector<64x128xf32>
      %45 = math.absf %44 : vector<64x128xf32>
      %c0_45 = arith.constant 0 : index
      %c0_46 = arith.constant 0 : index
      %46 = vector.load %arg13[%c0_45, %c0_46] : memref<8x128xf32, #tpu.memory_space<vmem>>, vector<8x128xf32>
      %47 = vector.shape_cast %45 : vector<64x128xf32> to vector<8x8x128xf32>
      %cst_47 = arith.constant dense<0.000000e+00> : vector<8x128xf32>
      %48 = vector.multi_reduction <add>, %47, %cst_47 [0] : vector<8x8x128xf32> to vector<8x128xf32>
      %cst_48 = arith.constant 1.22070313E-4 : f32
      %49 = vector.broadcast %cst_48 : f32 to vector<8x128xf32>
      %50 = arith.mulf %49, %48 : vector<8x128xf32>
      %51 = arith.addf %46, %50 : vector<8x128xf32>
      %c0_49 = arith.constant 0 : index
      %c0_50 = arith.constant 0 : index
      %52 = vector.load %arg13[%c0_49, %c0_50] : memref<8x128xf32, #tpu.memory_space<vmem>>, vector<8x128xf32>
      tpu.vector_store %arg13[%c0_49, %c0_50], %51 {strides = array<i32>} : memref<8x128xf32, #tpu.memory_space<vmem>>, vector<8x128xf32>,
    } else {
    }
    return
  }
  func.func @transform_12(%arg0: i32) -> (i32, i32) {
    %c0_i32 = arith.constant 0 : i32
    %c0_i32_0 = arith.constant 0 : i32
    return %arg0, %c0_i32 : i32, i32
  }
}

</mosaic_0001>

<bundles_post_ra>
// kernel: _lambda_.1
= control target key start
LH: loop header
LB: loop body
LE: loop exit
PB: predicated region body
PF: predicated region fallthrough
CT: control target
= control target key end

     0   :  { %s1548_s21 = smov 0   ;;  %s2251_s0 = inlined_call_operand.vmem [shape: f32[64,128], index: 0, kind: input, shape index: {}]   ;;  %s2252_s1 = inlined_call_operand.vmem [shape: f32[128,128], index: 1, kind: input, shape index: {}]   ;;  %s2253_s2 = inlined_call_operand.vmem [shape: f32[256,128], index: 2, kind: input, shape index: {}]   ;;  %s2254_s3 = inlined_call_operand.vmem [shape: f32[256,128], index: 3, kind: input, shape index: {}]   ;;  %s2255_s4 = inlined_call_operand.vmem [shape: f32[128,128], index: 4, kind: input, shape index: {}]   ;;  %s2256_s5 = inlined_call_operand.vmem [shape: f32[64,128], index: 5, kind: input, shape index: {}]   ;;  %s2257_s6 = inlined_call_operand.vmem [shape: f32[64,128], index: 6, kind: input, shape index: {}]   ;;  %s2258_s7 = inlined_call_operand.vmem [shape: f32[128,128], index: 7, kind: input, shape index: {}]   ;;  %s2259_s8 = inlined_call_operand.vmem [shape: f32[256,128], index: 8, kind: input, shape index: {}]   ;;  %s2260_s9 = inlined_call_operand.vmem [shape: f32[256,128], index: 9, kind: input, shape index: {}]   ;;  %s2261_s10 = inlined_call_operand.vmem [shape: f32[128,128], index: 10, kind: input, shape index: {}]   ;;  %s2262_s11 = inlined_call_operand.vmem [shape: f32[64,128], index: 11, kind: input, shape index: {}]   ;;  %s2263_s12 = inlined_call_operand.vmem [shape: f32[16,128], index: 12, kind: output, shape index: {}]  }
   0x1 LB: > { %p1431_p0 = scmp.ge.s32.totalorder %s1480_s21, 2  ;;  %s1480_s21 = sphi %s1548_s21, %s22_s21  }
   0x2   : > { %p54_p1 = scmp.lt.s32.totalorder (!%p1431_p0), %s1480_s21, 1  ;;  %p1433_p2 = scmp.ne.s32.totalorder (!%p1431_p0), %s1480_s21, 0 }
   0x3   : > { %47 = sbr.rel (%p1431_p0) target bundleno = 485 (0x1e5), region = 12 }
   0x8   : > { %s55_s22 = scalar_select %p54_p1, %s1480_s21, 1  ;;  %v1482_v0 = vmov 0.0  }
   0x9   : > { %62 = sbr.rel (%p1433_p2) target bundleno = 234 (0xea), region = 16 }
   0xa   : > { %s1432_s23 = sshll.u32 %s55_s22, 3 }
   0xb   : > { %s1559_s26 = scalar_lea.vmem %s2263_s12, %s1432_s23 }
   0xc   : > { %58 = vst [vmem:[%s1559_s26] sm:$0xff] %v1482_v0 }
   0xe   : > { %v73_v1 = vld [vmem:[%s2251_s0] sm:$0xff]  ;;  %v75_v2 = vld [vmem:[%s2251_s0 + $0x8] sm:$0xff]  ;;  %v77_v3 = vld [vmem:[%s2251_s0 + $0x10] sm:$0xff] }
   0xf   : > { %74 = vst [vmem:[#allocation2 + $0xb0] sm:$0xff] %v73_v1  ;;  %v79_v4 = vld [vmem:[%s2251_s0 + $0x18] sm:$0xff]  ;;  %v81_v5 = vld [vmem:[%s2251_s0 + $0x20] sm:$0xff]  ;;  %v83_v6 = vld [vmem:[%s2251_s0 + $0x28] sm:$0xff] }
  0x10   : > { %76 = vst [vmem:[#allocation2] sm:$0xff] %v75_v2  ;;  %v85_v7 = vld [vmem:[%s2251_s0 + $0x30] sm:$0xff]  ;;  %v87_v8 = vld [vmem:[%s2251_s0 + $0x38] sm:$0xff] }
  0x11   : > { %78 = vst [vmem:[#allocation2 + $0xd8] sm:$0xff] %v77_v3 }
  0x12   : > { %80 = vst [vmem:[#allocation2 + $0x18] sm:$0xff] %v79_v4 }
  0x13   : > { %82 = vst [vmem:[#allocation2 + $0x50] sm:$0xff] %v81_v5 }
  0x14   : > { %84 = vst [vmem:[#allocation2 + $0x68] sm:$0xff] %v83_v6 }
  0x15   : > { %86 = vst [vmem:[#allocation2 + $0x30] sm:$0xff] %v85_v7 }
  0x16   : > { %88 = vst [vmem:[#allocation2 + $0x48] sm:$0xff] %v87_v8 }
  0x17   : > { %94 = vsyncadd [#allocation4], 1024  ;;  %v106_v9 = vld [vmem:[%s2257_s6] sm:$0xff]  ;;  %v108_v10 = vld [vmem:[%s2257_s6 + $0x8] sm:$0xff] }
  0x18   : > { %107 = vst [vmem:[#allocation3 + $0x80] sm:$0xff] %v106_v9  ;;  %v110_v11 = vld [vmem:[%s2257_s6 + $0x10] sm:$0xff]  ;;  %v112_v12 = vld [vmem:[%s2257_s6 + $0x18] sm:$0xff]  ;;  %v114_v13 = vld [vmem:[%s2257_s6 + $0x20] sm:$0xff] }
  0x19   : > { %109 = vst [vmem:[#allocation3 + $0xc8] sm:$0xff] %v108_v10  ;;  %v116_v14 = vld [vmem:[%s2257_s6 + $0x28] sm:$0xff]  ;;  %v118_v15 = vld [vmem:[%s2257_s6 + $0x30] sm:$0xff]  ;;  %v120_v16 = vld [vmem:[%s2257_s6 + $0x38] sm:$0xff] }
  0x1a   : > { %111 = vst [vmem:[#allocation3 + $0xe8] sm:$0xff] %v110_v11 }
  0x1b   : > { %113 = vst [vmem:[#allocation3 + $0x78] sm:$0xff] %v112_v12 }
  0x1c   : > { %115 = vst [vmem:[#allocation3 + $0x8] sm:$0xff] %v114_v13 }
  0x1d   : > { %117 = vst [vmem:[#allocation3 + $0x90] sm:$0xff] %v116_v14 }
  0x1e   : > { %119 = vst [vmem:[#allocation3 + $0x58] sm:$0xff] %v118_v15 }
  0x1f   : > { %121 = vst [vmem:[#allocation3 + $0xa8] sm:$0xff] %v120_v16 }
  0x20   : > { %127 = vsyncadd [#allocation4 + $0x2], 1024 }
  0x21   : > { %1454 = dma.done.wait [#allocation4], 1024 }
  0x22   : > { %1455 = vsyncadd [#allocation4], 4294966272 }
  0x23   : > { %1456 = dma.done.wait [#allocation4 + $0x2], 1024 }
  0x24   : > { %1457 = vsyncadd [#allocation4 + $0x2], 4294966272  ;;  %v133_v17 = vld [vmem:[#allocation2 + $0xb0] sm:$0xff]  ;;  %v134_v18 = vld [vmem:[#allocation2] sm:$0xff] }
  0x25   : > { %v135_v19 = vld [vmem:[#allocation2 + $0xd8] sm:$0xff]  ;;  %v137_v21 = vld [vmem:[#allocation2 + $0x50] sm:$0xff]  ;;  %v141_v22 = vld [vmem:[#allocation3 + $0x80] sm:$0xff] }
  0x26   : > { %v136_v20 = vld [vmem:[#allocation2 + $0x18] sm:$0xff]  ;;  %v142_v23 = vld [vmem:[#allocation3 + $0xc8] sm:$0xff]  ;;  %v149_v26 = vsub.f32 %v133_v17, %v141_v22  ;;  %v146_v32 = vld [vmem:[#allocation3 + $0x90] sm:$0xff] }
  0x27   : > { %v143_v24 = vld [vmem:[#allocation3 + $0xe8] sm:$0xff]  ;;  %v144_v25 = vld [vmem:[#allocation3 + $0x78] sm:$0xff]  ;;  %v150_v28 = vsub.f32 %v134_v18, %v142_v23  ;;  %v186_v34 = vld [vmem:[%s2252_s1] sm:$0xff] }
  0x28   : > { %v145_v27 = vld [vmem:[#allocation3 + $0x8] sm:$0xff]  ;;  %v151_v29 = vsub.f32 %v135_v19, %v143_v24  ;;  %v152_v30 = vsub.f32 %v136_v20, %v144_v25  ;;  %v157_v33 = vand.u32 2147483647, %v149_v26  ;;  %v139_v38 = vld [vmem:[#allocation2 + $0x30] sm:$0xff]  ;;  %v147_v39 = vld [vmem:[#allocation3 + $0x58] sm:$0xff]  ;;  %187 = vst [vmem:[#allocation2 + $0xb0] sm:$0xff] %v186_v34 }
  0x29   : > { %v138_v31 = vld [vmem:[#allocation2 + $0x68] sm:$0xff]  ;;  %v153_v35 = vsub.f32 %v137_v21, %v145_v27  ;;  %v158_v36 = vand.u32 2147483647, %v150_v28  ;;  %v190_v44 = vld [vmem:[%s2252_s1 + $0x10] sm:$0xff]  ;;  %v192_v45 = vld [vmem:[%s2252_s1 + $0x18] sm:$0xff]  ;;  %v155_v49 = vsub.f32 %v139_v38, %v147_v39 }
  0x2a   : > { %v159_v37 = vand.u32 2147483647, %v151_v29  ;;  %v154_v40 = vsub.f32 %v138_v31, %v146_v32  ;;  %v160_v41 = vand.u32 2147483647, %v152_v30  ;;  %v188_v43 = vld [vmem:[%s2252_s1 + $0x8] sm:$0xff]  ;;  %v194_v48 = vld [vmem:[%s2252_s1 + $0x20] sm:$0xff] }
  0x2b   : > { %v166_v42 = vadd.f32 %v158_v36, %v157_v33  ;;  %v140_v46 = vld [vmem:[#allocation2 + $0x48] sm:$0xff]  ;;  %189 = vst [vmem:[#allocation2] sm:$0xff] %v188_v43  ;;  %v161_v50 = vand.u32 2147483647, %v153_v35  ;;  %v198_v53 = vld [vmem:[%s2252_s1 + $0x30] sm:$0xff]  ;;  %v200_v57 = vld [vmem:[%s2252_s1 + $0x38] sm:$0xff] }
  0x2c   : > { %v148_v47 = vld [vmem:[#allocation3 + $0xa8] sm:$0xff]  ;;  %191 = vst [vmem:[#allocation2 + $0xd8] sm:$0xff] %v190_v44  ;;  %v162_v55 = vand.u32 2147483647, %v154_v40  ;;  %v202_v58 = vld [vmem:[%s2252_s1 + $0x40] sm:$0xff]  ;;  %v206_v62 = vld [vmem:[%s2252_s1 + $0x50] sm:$0xff] }
  0x2d   : > { %v167_v51 = vadd.f32 %v166_v42, %v159_v37  ;;  %v196_v52 = vld [vmem:[%s2252_s1 + $0x28] sm:$0xff]  ;;  %193 = vst [vmem:[#allocation2 + $0x18] sm:$0xff] %v192_v45  ;;  %v156_v54 = vsub.f32 %v140_v46, %v148_v47  ;;  %v163_v59 = vand.u32 2147483647, %v155_v49  ;;  %v208_v1 = vld [vmem:[%s2252_s1 + $0x58] sm:$0xff]  ;;  %v210_v2 = vld [vmem:[%s2252_s1 + $0x60] sm:$0xff] }
  0x2e   : > { %195 = vst [vmem:[#allocation2 + $0x50] sm:$0xff] %v194_v48  ;;  %v204_v61 = vld [vmem:[%s2252_s1 + $0x48] sm:$0xff]  ;;  %v214_v5 = vld [vmem:[%s2252_s1 + $0x70] sm:$0xff]  ;;  %v216_v7 = vld [vmem:[%s2252_s1 + $0x78] sm:$0xff] }
  0x2f   : > { %v168_v56 = vadd.f32 %v167_v51, %v160_v41  ;;  %197 = vst [vmem:[#allocation2 + $0x68] sm:$0xff] %v196_v52  ;;  %v164_v63 = vand.u32 2147483647, %v156_v54  ;;  %v212_v4 = vld [vmem:[%s2252_s1 + $0x68] sm:$0xff]  ;;  %v165_v8 = vld [vmem:[%s1559_s26] sm:$0xff] }
  0x30   : > { %199 = vst [vmem:[#allocation2 + $0x30] sm:$0xff] %v198_v53 }
  0x31   : > { %v169_v60 = vadd.f32 %v168_v56, %v161_v50  ;;  %201 = vst [vmem:[#allocation2 + $0x48] sm:$0xff] %v200_v57 }
  0x32   : > { %203 = vst [vmem:[#allocation2 + $0x80] sm:$0xff] %v202_v58 }
  0x33   : > { %v170_v0 = vadd.f32 %v169_v60, %v162_v55  ;;  %205 = vst [vmem:[#allocation2 + $0x88] sm:$0xff] %v204_v61 }
  0x34   : > { %207 = vst [vmem:[#allocation2 + $0xe8] sm:$0xff] %v206_v62 }
  0x35   : > { %v171_v3 = vadd.f32 %v170_v0, %v163_v59  ;;  %209 = vst [vmem:[#allocation2 + $0xb8] sm:$0xff] %v208_v1 }
  0x36   : > { %211 = vst [vmem:[#allocation2 + $0x60] sm:$0xff] %v210_v2 }
  0x37   : > { %v172_v6 = vadd.f32 %v171_v3, %v164_v63  ;;  %213 = vst [vmem:[#allocation2 + $0xf0] sm:$0xff] %v212_v4 }
  0x38   : > { %215 = vst [vmem:[#allocation2 + $0x8] sm:$0xff] %v214_v5 }
  0x39   : > { %v173_v9 = vmul.f32 0.00012207031, %v172_v6  ;;  %217 = vst [vmem:[#allocation2 + $0x78] sm:$0xff] %v216_v7 }
  0x3b   : > { %v174_v10 = vadd.f32 %v173_v9, %v165_v8 }
  0x3d   : > { %175 = vst [vmem:[%s1559_s26] sm:$0xff] %v174_v10 }
  0x3e   : > { %223 = vsyncadd [#allocation4], 2048  ;;  %v234_v11 = vld [vmem:[%s2258_s7] sm:$0xff]  ;;  %v236_v12 = vld [vmem:[%s2258_s7 + $0x8] sm:$0xff] }
  0x3f   : > { %235 = vst [vmem:[#allocation3 + $0x80] sm:$0xff] %v234_v11  ;;  %v238_v13 = vld [vmem:[%s2258_s7 + $0x10] sm:$0xff]  ;;  %v240_v14 = vld [vmem:[%s2258_s7 + $0x18] sm:$0xff]  ;;  %v242_v15 = vld [vmem:[%s2258_s7 + $0x20] sm:$0xff] }
  0x40   : > { %237 = vst [vmem:[#allocation3 + $0xc8] sm:$0xff] %v236_v12  ;;  %v244_v16 = vld [vmem:[%s2258_s7 + $0x28] sm:$0xff]  ;;  %v246_v17 = vld [vmem:[%s2258_s7 + $0x30] sm:$0xff]  ;;  %v248_v18 = vld [vmem:[%s2258_s7 + $0x38] sm:$0xff] }
  0x41   : > { %239 = vst [vmem:[#allocation3 + $0xe8] sm:$0xff] %v238_v13  ;;  %v250_v19 = vld [vmem:[%s2258_s7 + $0x40] sm:$0xff]  ;;  %v252_v20 = vld [vmem:[%s2258_s7 + $0x48] sm:$0xff]  ;;  %v254_v21 = vld [vmem:[%s2258_s7 + $0x50] sm:$0xff] }
  0x42   : > { %241 = vst [vmem:[#allocation3 + $0x78] sm:$0xff] %v240_v14  ;;  %v256_v22 = vld [vmem:[%s2258_s7 + $0x58] sm:$0xff]  ;;  %v258_v23 = vld [vmem:[%s2258_s7 + $0x60] sm:$0xff]  ;;  %v260_v24 = vld [vmem:[%s2258_s7 + $0x68] sm:$0xff] }
  0x43   : > { %243 = vst [vmem:[#allocation3 + $0x8] sm:$0xff] %v242_v15  ;;  %v262_v25 = vld [vmem:[%s2258_s7 + $0x70] sm:$0xff]  ;;  %v264_v26 = vld [vmem:[%s2258_s7 + $0x78] sm:$0xff] }
  0x44   : > { %245 = vst [vmem:[#allocation3 + $0x90] sm:$0xff] %v244_v16 }
  0x45   : > { %247 = vst [vmem:[#allocation3 + $0x58] sm:$0xff] %v246_v17 }
  0x46   : > { %249 = vst [vmem:[#allocation3 + $0xa8] sm:$0xff] %v248_v18 }
  0x47   : > { %251 = vst [vmem:[#allocation3 + $0xd0] sm:$0xff] %v250_v19 }
  0x48   : > { %253 = vst [vmem:[#allocation3 + $0xb0] sm:$0xff] %v252_v20 }
  0x49   : > { %255 = vst [vmem:[#allocation3 + $0x38] sm:$0xff] %v254_v21 }
  0x4a   : > { %257 = vst [vmem:[#allocation3 + $0x40] sm:$0xff] %v256_v22 }
  0x4b   : > { %259 = vst [vmem:[#allocation3 + $0xe0] sm:$0xff] %v258_v23 }
  0x4c   : > { %261 = vst [vmem:[#allocation3 + $0x60] sm:$0xff] %v260_v24 }
  0x4d   : > { %263 = vst [vmem:[#allocation3 + $0x18] sm:$0xff] %v262_v25 }
  0x4e   : > { %265 = vst [vmem:[#allocation3 + $0x68] sm:$0xff] %v264_v26 }
  0x4f   : > { %271 = vsyncadd [#allocation4 + $0x2], 2048 }
  0x50   : > { %1458 = dma.done.wait [#allocation4], 2048 }
  0x51   : > { %1459 = vsyncadd [#allocation4], 4294965248 }
  0x52   : > { %1460 = dma.done.wait [#allocation4 + $0x2], 2048 }
  0x53   : > { %1461 = vsyncadd [#allocation4 + $0x2], 4294965248  ;;  %v277_v27 = vld [vmem:[#allocation2 + $0xb0] sm:$0xff]  ;;  %v278_v28 = vld [vmem:[#allocation2] sm:$0xff] }
  0x54   : > { %v279_v29 = vld [vmem:[#allocation2 + $0xd8] sm:$0xff]  ;;  %v293_v31 = vld [vmem:[#allocation3 + $0x80] sm:$0xff]  ;;  %v294_v32 = vld [vmem:[#allocation3 + $0xc8] sm:$0xff] }
  0x55   : > { %v280_v30 = vld [vmem:[#allocation2 + $0x18] sm:$0xff]  ;;  %v295_v33 = vld [vmem:[#allocation3 + $0xe8] sm:$0xff]  ;;  %v309_v35 = vsub.f32 %v277_v27, %v293_v31  ;;  %v310_v36 = vsub.f32 %v278_v28, %v294_v32  ;;  %v281_v37 = vld [vmem:[#allocation2 + $0x50] sm:$0xff] }
  0x56   : > { %v296_v34 = vld [vmem:[#allocation3 + $0x78] sm:$0xff]  ;;  %v297_v38 = vld [vmem:[#allocation3 + $0x8] sm:$0xff]  ;;  %v311_v39 = vsub.f32 %v279_v29, %v295_v33  ;;  %v298_v43 = vld [vmem:[#allocation3 + $0x90] sm:$0xff] }
  0x57   : > { %v312_v40 = vsub.f32 %v280_v30, %v296_v34  ;;  %v325_v41 = vand.u32 2147483647, %v309_v35  ;;  %v282_v42 = vld [vmem:[#allocation2 + $0x68] sm:$0xff]  ;;  %v326_v44 = vand.u32 2147483647, %v310_v36  ;;  %v313_v45 = vsub.f32 %v281_v37, %v297_v38  ;;  %v283_v47 = vld [vmem:[#allocation2 + $0x30] sm:$0xff] }
  0x58   : > { %v327_v46 = vand.u32 2147483647, %v311_v39  ;;  %v299_v48 = vld [vmem:[#allocation3 + $0x58] sm:$0xff]  ;;  %v314_v49 = vsub.f32 %v282_v42, %v298_v43  ;;  %v284_v52 = vld [vmem:[#allocation2 + $0x48] sm:$0xff]  ;;  %v285_v54 = vld [vmem:[#allocation2 + $0x80] sm:$0xff] }
  0x59   : > { %v328_v50 = vand.u32 2147483647, %v312_v40  ;;  %v342_v51 = vadd.f32 %v326_v44, %v325_v41  ;;  %v300_v53 = vld [vmem:[#allocation3 + $0xa8] sm:$0xff]  ;;  %v315_v55 = vsub.f32 %v283_v47, %v299_v48  ;;  %v329_v56 = vand.u32 2147483647, %v313_v45  ;;  %v301_v58 = vld [vmem:[#allocation3 + $0xd0] sm:$0xff] }
  0x5a   : > { %v370_v59 = vld [vmem:[%s2253_s2] sm:$0xff]  ;;  %v372_v60 = vld [vmem:[%s2253_s2 + $0x8] sm:$0xff]  ;;  %v316_v61 = vsub.f32 %v284_v52, %v300_v53  ;;  %v330_v62 = vand.u32 2147483647, %v314_v49  ;;  %v374_v0 = vld [vmem:[%s2253_s2 + $0x10] sm:$0xff]  ;;  %v317_v5 = vsub.f32 %v285_v54, %v301_v58 }
  0x5b   : > { %v343_v57 = vadd.f32 %v342_v51, %v327_v46  ;;  %371 = vst [vmem:[#allocation2 + $0xb0] sm:$0xff] %v370_v59  ;;  %v376_v1 = vld [vmem:[%s2253_s2 + $0x18] sm:$0xff]  ;;  %v286_v2 = vld [vmem:[#allocation2 + $0x88] sm:$0xff]  ;;  %v302_v3 = vld [vmem:[#allocation3 + $0xb0] sm:$0xff]  ;;  %v331_v6 = vand.u32 2147483647, %v315_v55 }
  0x5c   : > { %373 = vst [vmem:[#allocation2] sm:$0xff] %v372_v60  ;;  %v378_v4 = vld [vmem:[%s2253_s2 + $0x20] sm:$0xff]  ;;  %v380_v8 = vld [vmem:[%s2253_s2 + $0x28] sm:$0xff]  ;;  %v303_v10 = vld [vmem:[#allocation3 + $0x38] sm:$0xff]  ;;  %v318_v12 = vsub.f32 %v286_v2, %v302_v3  ;;  %v332_v13 = vand.u32 2147483647, %v316_v61 }
  0x5d   : > { %v344_v63 = vadd.f32 %v343_v57, %v328_v50  ;;  %375 = vst [vmem:[#allocation2 + $0xd8] sm:$0xff] %v374_v0  ;;  %v287_v9 = vld [vmem:[#allocation2 + $0xe8] sm:$0xff]  ;;  %v382_v11 = vld [vmem:[%s2253_s2 + $0x30] sm:$0xff]  ;;  %v384_v15 = vld [vmem:[%s2253_s2 + $0x38] sm:$0xff]  ;;  %v333_v20 = vand.u32 2147483647, %v317_v5 }
  0x5e   : > { %377 = vst [vmem:[#allocation2 + $0x18] sm:$0xff] %v376_v1  ;;  %v288_v16 = vld [vmem:[#allocation2 + $0xb8] sm:$0xff]  ;;  %v304_v17 = vld [vmem:[#allocation3 + $0x40] sm:$0xff]  ;;  %v319_v19 = vsub.f32 %v287_v9, %v303_v10  ;;  %v388_v22 = vld [vmem:[%s2253_s2 + $0x48] sm:$0xff]  ;;  %v334_v27 = vand.u32 2147483647, %v318_v12 }
  0x5f   : > { %v345_v7 = vadd.f32 %v344_v63, %v329_v56  ;;  %379 = vst [vmem:[#allocation2 + $0x50] sm:$0xff] %v378_v4  ;;  %v386_v18 = vld [vmem:[%s2253_s2 + $0x40] sm:$0xff]  ;;  %v390_v25 = vld [vmem:[%s2253_s2 + $0x50] sm:$0xff]  ;;  %v320_v26 = vsub.f32 %v288_v16, %v304_v17  ;;  %v392_v29 = vld [vmem:[%s2253_s2 + $0x58] sm:$0xff] }
  0x60   : > { %381 = vst [vmem:[#allocation2 + $0x68] sm:$0xff] %v380_v8  ;;  %v289_v23 = vld [vmem:[#allocation2 + $0x60] sm:$0xff]  ;;  %v290_v30 = vld [vmem:[#allocation2 + $0xf0] sm:$0xff]  ;;  %v335_v34 = vand.u32 2147483647, %v319_v19  ;;  %v396_v36 = vld [vmem:[%s2253_s2 + $0x68] sm:$0xff] }
  0x61   : > { %v346_v14 = vadd.f32 %v345_v7, %v330_v62  ;;  %383 = vst [vmem:[#allocation2 + $0x30] sm:$0xff] %v382_v11  ;;  %v305_v24 = vld [vmem:[#allocation3 + $0xe0] sm:$0xff]  ;;  %v291_v37 = vld [vmem:[#allocation2 + $0x8] sm:$0xff]  ;;  %v307_v38 = vld [vmem:[#allocation3 + $0x18] sm:$0xff]  ;;  %v336_v41 = vand.u32 2147483647, %v320_v26 }
  0x62   : > { %385 = vst [vmem:[#allocation2 + $0x48] sm:$0xff] %v384_v15  ;;  %v306_v31 = vld [vmem:[#allocation3 + $0x60] sm:$0xff]  ;;  %v321_v33 = vsub.f32 %v289_v23, %v305_v24  ;;  %v398_v39 = vld [vmem:[%s2253_s2 + $0x70] sm:$0xff]  ;;  %v400_v43 = vld [vmem:[%s2253_s2 + $0x78] sm:$0xff]  ;;  %v323_v47 = vsub.f32 %v291_v37, %v307_v38 }
  0x63   : > { %v347_v21 = vadd.f32 %v346_v14, %v331_v6  ;;  %387 = vst [vmem:[#allocation2 + $0x80] sm:$0xff] %v386_v18  ;;  %v394_v32 = vld [vmem:[%s2253_s2 + $0x60] sm:$0xff]  ;;  %v322_v40 = vsub.f32 %v290_v30, %v306_v31  ;;  %v292_v44 = vld [vmem:[#allocation2 + $0x78] sm:$0xff]  ;;  %v308_v45 = vld [vmem:[#allocation3 + $0x68] sm:$0xff] }
  0x64   : > { %389 = vst [vmem:[#allocation2 + $0x88] sm:$0xff] %v388_v22  ;;  %v402_v46 = vld [vmem:[%s2253_s2 + $0x80] sm:$0xff]  ;;  %v337_v48 = vand.u32 2147483647, %v321_v33  ;;  %v404_v50 = vld [vmem:[%s2253_s2 + $0x88] sm:$0xff]  ;;  %v406_v51 = vld [vmem:[%s2253_s2 + $0x90] sm:$0xff]  ;;  %v324_v52 = vsub.f32 %v292_v44, %v308_v45 }
  0x65   : > { %v348_v28 = vadd.f32 %v347_v21, %v332_v13  ;;  %391 = vst [vmem:[#allocation2 + $0xe8] sm:$0xff] %v390_v25  ;;  %v338_v53 = vand.u32 2147483647, %v322_v40  ;;  %v408_v55 = vld [vmem:[%s2253_s2 + $0x98] sm:$0xff]  ;;  %v410_v56 = vld [vmem:[%s2253_s2 + $0xa0] sm:$0xff]  ;;  %v412_v59 = vld [vmem:[%s2253_s2 + $0xa8] sm:$0xff] }
  0x66   : > { %393 = vst [vmem:[#allocation2 + $0xb8] sm:$0xff] %v392_v29  ;;  %v339_v57 = vand.u32 2147483647, %v323_v47  ;;  %v414_v60 = vld [vmem:[%s2253_s2 + $0xb0] sm:$0xff]  ;;  %v340_v61 = vand.u32 2147483647, %v324_v52 }
  0x67   : > { %v349_v35 = vadd.f32 %v348_v28, %v333_v20  ;;  %395 = vst [vmem:[#allocation2 + $0x60] sm:$0xff] %v394_v32  ;;  %v416_v63 = vld [vmem:[%s2253_s2 + $0xb8] sm:$0xff]  ;;  %v418_v0 = vld [vmem:[%s2253_s2 + $0xc0] sm:$0xff]  ;;  %v420_v2 = vld [vmem:[%s2253_s2 + $0xc8] sm:$0xff] }
  0x68   : > { %397 = vst [vmem:[#allocation2 + $0xf0] sm:$0xff] %v396_v36  ;;  %v422_v3 = vld [vmem:[%s2253_s2 + $0xd0] sm:$0xff]  ;;  %v424_v5 = vld [vmem:[%s2253_s2 + $0xd8] sm:$0xff]  ;;  %v341_v6 = vld [vmem:[%s1559_s26] sm:$0xff] }
  0x69   : > { %v350_v42 = vadd.f32 %v349_v35, %v334_v27  ;;  %399 = vst [vmem:[#allocation2 + $0x8] sm:$0xff] %v398_v39  ;;  %v426_v7 = vld [vmem:[%s2253_s2 + $0xe0] sm:$0xff]  ;;  %v428_v9 = vld [vmem:[%s2253_s2 + $0xe8] sm:$0xff]  ;;  %v430_v11 = vld [vmem:[%s2253_s2 + $0xf0] sm:$0xff] }
  0x6a   : > { %401 = vst [vmem:[#allocation2 + $0x78] sm:$0xff] %v400_v43  ;;  %v432_v12 = vld [vmem:[%s2253_s2 + $0xf8] sm:$0xff] }
  0x6b   : > { %v351_v49 = vadd.f32 %v350_v42, %v335_v34  ;;  %403 = vst [vmem:[#allocation2 + $0x38] sm:$0xff] %v402_v46 }
  0x6c   : > { %405 = vst [vmem:[#allocation2 + $0x58] sm:$0xff] %v404_v50 }
  0x6d   : > { %v352_v54 = vadd.f32 %v351_v49, %v336_v41  ;;  %407 = vst [vmem:[#allocation2 + $0x40] sm:$0xff] %v406_v51 }
  0x6e   : > { %409 = vst [vmem:[#allocation2 + $0xc8] sm:$0xff] %v408_v55 }
  0x6f   : > { %v353_v58 = vadd.f32 %v352_v54, %v337_v48  ;;  %411 = vst [vmem:[#allocation2 + $0xe0] sm:$0xff] %v410_v56 }
  0x70   : > { %413 = vst [vmem:[#allocation2 + $0x90] sm:$0xff] %v412_v59 }
  0x71   : > { %v354_v62 = vadd.f32 %v353_v58, %v338_v53  ;;  %415 = vst [vmem:[#allocation2 + $0x70] sm:$0xff] %v414_v60 }
  0x72   : > { %417 = vst [vmem:[#allocation2 + $0xc0] sm:$0xff] %v416_v63 }
  0x73   : > { %v355_v1 = vadd.f32 %v354_v62, %v339_v57  ;;  %419 = vst [vmem:[#allocation2 + $0xa8] sm:$0xff] %v418_v0 }
  0x74   : > { %421 = vst [vmem:[#allocation2 + $0xd0] sm:$0xff] %v420_v2 }
  0x75   : > { %v356_v4 = vadd.f32 %v355_v1, %v340_v61  ;;  %423 = vst [vmem:[#allocation2 + $0x10] sm:$0xff] %v422_v3 }
  0x76   : > { %425 = vst [vmem:[#allocation2 + $0x28] sm:$0xff] %v424_v5 }
  0x77   : > { %v357_v8 = vmul.f32 6.1035156e-05, %v356_v4  ;;  %427 = vst [vmem:[#allocation2 + $0xa0] sm:$0xff] %v426_v7 }
  0x78   : > { %429 = vst [vmem:[#allocation2 + $0xf8] sm:$0xff] %v428_v9 }
  0x79   : > { %v358_v10 = vadd.f32 %v357_v8, %v341_v6  ;;  %431 = vst [vmem:[#allocation2 + $0x20] sm:$0xff] %v430_v11 }
  0x7a   : > { %433 = vst [vmem:[#allocation2 + $0x98] sm:$0xff] %v432_v12 }
  0x7b   : > { %359 = vst [vmem:[%s1559_s26] sm:$0xff] %v358_v10 }
  0x7c   : > { %439 = vsyncadd [#allocation4], 4096  ;;  %v450_v13 = vld [vmem:[%s2259_s8] sm:$0xff]  ;;  %v452_v14 = vld [vmem:[%s2259_s8 + $0x8] sm:$0xff] }
  0x7d   : > { %451 = vst [vmem:[#allocation3 + $0x80] sm:$0xff] %v450_v13  ;;  %v454_v15 = vld [vmem:[%s2259_s8 + $0x10] sm:$0xff]  ;;  %v456_v16 = vld [vmem:[%s2259_s8 + $0x18] sm:$0xff]  ;;  %v458_v17 = vld [vmem:[%s2259_s8 + $0x20] sm:$0xff] }
  0x7e   : > { %453 = vst [vmem:[#allocation3 + $0xc8] sm:$0xff] %v452_v14  ;;  %v460_v18 = vld [vmem:[%s2259_s8 + $0x28] sm:$0xff]  ;;  %v462_v19 = vld [vmem:[%s2259_s8 + $0x30] sm:$0xff]  ;;  %v464_v20 = vld [vmem:[%s2259_s8 + $0x38] sm:$0xff] }
  0x7f   : > { %455 = vst [vmem:[#allocation3 + $0xe8] sm:$0xff] %v454_v15  ;;  %v466_v21 = vld [vmem:[%s2259_s8 + $0x40] sm:$0xff]  ;;  %v468_v22 = vld [vmem:[%s2259_s8 + $0x48] sm:$0xff]  ;;  %v470_v23 = vld [vmem:[%s2259_s8 + $0x50] sm:$0xff] }
  0x80   : > { %457 = vst [vmem:[#allocation3 + $0x78] sm:$0xff] %v456_v16  ;;  %v472_v24 = vld [vmem:[%s2259_s8 + $0x58] sm:$0xff]  ;;  %v474_v25 = vld [vmem:[%s2259_s8 + $0x60] sm:$0xff]  ;;  %v476_v26 = vld [vmem:[%s2259_s8 + $0x68] sm:$0xff] }
  0x81   : > { %459 = vst [vmem:[#allocation3 + $0x8] sm:$0xff] %v458_v17  ;;  %v478_v27 = vld [vmem:[%s2259_s8 + $0x70] sm:$0xff]  ;;  %v480_v28 = vld [vmem:[%s2259_s8 + $0x78] sm:$0xff]  ;;  %v482_v29 = vld [vmem:[%s2259_s8 + $0x80] sm:$0xff] }
  0x82   : > { %461 = vst [vmem:[#allocation3 + $0x90] sm:$0xff] %v460_v18  ;;  %v484_v30 = vld [vmem:[%s2259_s8 + $0x88] sm:$0xff]  ;;  %v486_v31 = vld [vmem:[%s2259_s8 + $0x90] sm:$0xff]  ;;  %v488_v32 = vld [vmem:[%s2259_s8 + $0x98] sm:$0xff] }
  0x83   : > { %463 = vst [vmem:[#allocation3 + $0x58] sm:$0xff] %v462_v19  ;;  %v490_v33 = vld [vmem:[%s2259_s8 + $0xa0] sm:$0xff]  ;;  %v492_v34 = vld [vmem:[%s2259_s8 + $0xa8] sm:$0xff]  ;;  %v494_v35 = vld [vmem:[%s2259_s8 + $0xb0] sm:$0xff] }
  0x84   : > { %465 = vst [vmem:[#allocation3 + $0xa8] sm:$0xff] %v464_v20  ;;  %v496_v36 = vld [vmem:[%s2259_s8 + $0xb8] sm:$0xff]  ;;  %v498_v37 = vld [vmem:[%s2259_s8 + $0xc0] sm:$0xff]  ;;  %v500_v38 = vld [vmem:[%s2259_s8 + $0xc8] sm:$0xff] }
  0x85   : > { %467 = vst [vmem:[#allocation3 + $0xd0] sm:$0xff] %v466_v21  ;;  %v502_v39 = vld [vmem:[%s2259_s8 + $0xd0] sm:$0xff]  ;;  %v504_v40 = vld [vmem:[%s2259_s8 + $0xd8] sm:$0xff]  ;;  %v506_v41 = vld [vmem:[%s2259_s8 + $0xe0] sm:$0xff] }
  0x86   : > { %469 = vst [vmem:[#allocation3 + $0xb0] sm:$0xff] %v468_v22  ;;  %v508_v42 = vld [vmem:[%s2259_s8 + $0xe8] sm:$0xff]  ;;  %v510_v43 = vld [vmem:[%s2259_s8 + $0xf0] sm:$0xff]  ;;  %v512_v44 = vld [vmem:[%s2259_s8 + $0xf8] sm:$0xff] }
  0x87   : > { %471 = vst [vmem:[#allocation3 + $0x38] sm:$0xff] %v470_v23 }
  0x88   : > { %473 = vst [vmem:[#allocation3 + $0x40] sm:$0xff] %v472_v24 }
  0x89   : > { %475 = vst [vmem:[#allocation3 + $0xe0] sm:$0xff] %v474_v25 }
  0x8a   : > { %477 = vst [vmem:[#allocation3 + $0x60] sm:$0xff] %v476_v26 }
  0x8b   : > { %479 = vst [vmem:[#allocation3 + $0x18] sm:$0xff] %v478_v27 }
  0x8c   : > { %481 = vst [vmem:[#allocation3 + $0x68] sm:$0xff] %v480_v28 }
  0x8d   : > { %483 = vst [vmem:[#allocation3 + $0x10] sm:$0xff] %v482_v29 }
  0x8e   : > { %485 = vst [vmem:[#allocation3 + $0x70] sm:$0xff] %v484_v30 }
  0x8f   : > { %487 = vst [vmem:[#allocation3 + $0x50] sm:$0xff] %v486_v31 }
  0x90   : > { %489 = vst [vmem:[#allocation3 + $0xa0] sm:$0xff] %v488_v32 }
  0x91   : > { %491 = vst [vmem:[#allocation3 + $0xd8] sm:$0xff] %v490_v33 }
  0x92   : > { %493 = vst [vmem:[#allocation3 + $0x30] sm:$0xff] %v492_v34 }
  0x93   : > { %495 = vst [vmem:[#allocation3 + $0x20] sm:$0xff] %v494_v35 }
  0x94   : > { %497 = vst [vmem:[#allocation3 + $0xf0] sm:$0xff] %v496_v36 }
  0x95   : > { %499 = vst [vmem:[#allocation3 + $0x88] sm:$0xff] %v498_v37 }
  0x96   : > { %501 = vst [vmem:[#allocation3 + $0x48] sm:$0xff] %v500_v38 }
  0x97   : > { %503 = vst [vmem:[#allocation3 + $0xf8] sm:$0xff] %v502_v39 }
  0x98   : > { %505 = vst [vmem:[#allocation3 + $0xc0] sm:$0xff] %v504_v40 }
  0x99   : > { %507 = vst [vmem:[#allocation3 + $0xb8] sm:$0xff] %v506_v41 }
  0x9a   : > { %509 = vst [vmem:[#allocation3] sm:$0xff] %v508_v42 }
  0x9b   : > { %511 = vst [vmem:[#allocation3 + $0x28] sm:$0xff] %v510_v43 }
  0x9c   : > { %513 = vst [vmem:[#allocation3 + $0x98] sm:$0xff] %v512_v44 }
  0x9d   : > { %519 = vsyncadd [#allocation4 + $0x2], 4096 }
  0x9e   : > { %1462 = dma.done.wait [#allocation4], 4096 }
  0x9f   : > { %1463 = vsyncadd [#allocation4], 4294963200 }
  0xa0   : > { %1464 = dma.done.wait [#allocation4 + $0x2], 4096 }
  0xa1   : > { %1465 = vsyncadd [#allocation4 + $0x2], 4294963200  ;;  %v525_v45 = vld [vmem:[#allocation2 + $0xb0] sm:$0xff]  ;;  %v526_v46 = vld [vmem:[#allocation2] sm:$0xff] }
  0xa2   : > { %v557_v47 = vld [vmem:[#allocation3 + $0x80] sm:$0xff]  ;;  %v558_v48 = vld [vmem:[#allocation3 + $0xc8] sm:$0xff]  ;;  %v527_v49 = vld [vmem:[#allocation2 + $0xd8] sm:$0xff] }
  0xa3   : > { %v559_v50 = vld [vmem:[#allocation3 + $0xe8] sm:$0xff]  ;;  %v589_v51 = vsub.f32 %v525_v45, %v557_v47  ;;  %v590_v52 = vsub.f32 %v526_v46, %v558_v48  ;;  %v528_v53 = vld [vmem:[#allocation2 + $0x18] sm:$0xff]  ;;  %v529_v56 = vld [vmem:[#allocation2 + $0x50] sm:$0xff] }
  0xa4   : > { %v560_v54 = vld [vmem:[#allocation3 + $0x78] sm:$0xff]  ;;  %v591_v55 = vsub.f32 %v527_v49, %v559_v50  ;;  %v561_v57 = vld [vmem:[#allocation3 + $0x8] sm:$0xff]  ;;  %v562_v62 = vld [vmem:[#allocation3 + $0x90] sm:$0xff] }
  0xa5   : > { %v592_v58 = vsub.f32 %v528_v53, %v560_v54  ;;  %v621_v59 = vand.u32 2147483647, %v589_v51  ;;  %v622_v60 = vand.u32 2147483647, %v590_v52  ;;  %v530_v61 = vld [vmem:[#allocation2 + $0x68] sm:$0xff]  ;;  %v593_v63 = vsub.f32 %v529_v56, %v561_v57  ;;  %v531_v1 = vld [vmem:[#allocation2 + $0x30] sm:$0xff] }
  0xa6   : > { %v623_v0 = vand.u32 2147483647, %v591_v55  ;;  %v563_v2 = vld [vmem:[#allocation3 + $0x58] sm:$0xff]  ;;  %v594_v3 = vsub.f32 %v530_v61, %v562_v62  ;;  %v532_v6 = vld [vmem:[#allocation2 + $0x48] sm:$0xff]  ;;  %v533_v11 = vld [vmem:[#allocation2 + $0x80] sm:$0xff] }
  0xa7   : > { %v624_v4 = vand.u32 2147483647, %v592_v58  ;;  %v654_v5 = vadd.f32 %v622_v60, %v621_v59  ;;  %v564_v7 = vld [vmem:[#allocation3 + $0xa8] sm:$0xff]  ;;  %v595_v8 = vsub.f32 %v531_v1, %v563_v2  ;;  %v625_v9 = vand.u32 2147483647, %v593_v63  ;;  %v565_v12 = vld [vmem:[#allocation3 + $0xd0] sm:$0xff] }
  0xa8   : > { %v596_v13 = vsub.f32 %v532_v6, %v564_v7  ;;  %v626_v14 = vand.u32 2147483647, %v594_v3  ;;  %v534_v16 = vld [vmem:[#allocation2 + $0x88] sm:$0xff]  ;;  %v566_v17 = vld [vmem:[#allocation3 + $0xb0] sm:$0xff]  ;;  %v597_v18 = vsub.f32 %v533_v11, %v565_v12  ;;  %v567_v22 = vld [vmem:[#allocation3 + $0x38] sm:$0xff] }
  0xa9   : > { %v655_v10 = vadd.f32 %v654_v5, %v623_v0  ;;  %v627_v19 = vand.u32 2147483647, %v595_v8  ;;  %v535_v21 = vld [vmem:[#allocation2 + $0xe8] sm:$0xff]  ;;  %v598_v23 = vsub.f32 %v534_v16, %v566_v17  ;;  %v536_v26 = vld [vmem:[#allocation2 + $0xb8] sm:$0xff]  ;;  %v568_v27 = vld [vmem:[#allocation3 + $0x40] sm:$0xff] }
  0xaa   : > { %v628_v24 = vand.u32 2147483647, %v596_v13  ;;  %v599_v28 = vsub.f32 %v535_v21, %v567_v22  ;;  %v629_v29 = vand.u32 2147483647, %v597_v18  ;;  %v537_v31 = vld [vmem:[#allocation2 + $0x60] sm:$0xff]  ;;  %v600_v33 = vsub.f32 %v536_v26, %v568_v27  ;;  %v538_v36 = vld [vmem:[#allocation2 + $0xf0] sm:$0xff] }
  0xab   : > { %v656_v15 = vadd.f32 %v655_v10, %v624_v4  ;;  %v569_v32 = vld [vmem:[#allocation3 + $0xe0] sm:$0xff]  ;;  %v630_v34 = vand.u32 2147483647, %v598_v23  ;;  %v539_v41 = vld [vmem:[#allocation2 + $0x8] sm:$0xff]  ;;  %v571_v42 = vld [vmem:[#allocation3 + $0x18] sm:$0xff] }
  0xac   : > { %v570_v37 = vld [vmem:[#allocation3 + $0x60] sm:$0xff]  ;;  %v601_v38 = vsub.f32 %v537_v31, %v569_v32  ;;  %v631_v39 = vand.u32 2147483647, %v599_v28  ;;  %v632_v44 = vand.u32 2147483647, %v600_v33  ;;  %v540_v46 = vld [vmem:[#allocation2 + $0x78] sm:$0xff]  ;;  %v603_v48 = vsub.f32 %v539_v41, %v571_v42 }
  0xad   : > { %v657_v20 = vadd.f32 %v656_v15, %v625_v9  ;;  %v602_v43 = vsub.f32 %v538_v36, %v570_v37  ;;  %v572_v47 = vld [vmem:[#allocation3 + $0x68] sm:$0xff]  ;;  %v541_v51 = vld [vmem:[#allocation2 + $0x38] sm:$0xff]  ;;  %v573_v52 = vld [vmem:[#allocation3 + $0x10] sm:$0xff] }
  0xae   : > { %v633_v49 = vand.u32 2147483647, %v601_v38  ;;  %v604_v53 = vsub.f32 %v540_v46, %v572_v47  ;;  %v542_v56 = vld [vmem:[#allocation2 + $0x58] sm:$0xff]  ;;  %v574_v57 = vld [vmem:[#allocation3 + $0x70] sm:$0xff]  ;;  %v605_v58 = vsub.f32 %v541_v51, %v573_v52  ;;  %v635_v59 = vand.u32 2147483647, %v603_v48 }
  0xaf   : > { %v658_v25 = vadd.f32 %v657_v20, %v626_v14  ;;  %v634_v54 = vand.u32 2147483647, %v602_v43  ;;  %v543_v61 = vld [vmem:[#allocation2 + $0x40] sm:$0xff]  ;;  %v575_v62 = vld [vmem:[#allocation3 + $0x50] sm:$0xff]  ;;  %v606_v63 = vsub.f32 %v542_v56, %v574_v57  ;;  %v544_v2 = vld [vmem:[#allocation2 + $0xc8] sm:$0xff] }
  0xb0   : > { %v636_v0 = vand.u32 2147483647, %v604_v53  ;;  %v576_v3 = vld [vmem:[#allocation3 + $0xa0] sm:$0xff]  ;;  %v607_v4 = vsub.f32 %v543_v61, %v575_v62  ;;  %v637_v5 = vand.u32 2147483647, %v605_v58  ;;  %v577_v8 = vld [vmem:[#allocation3 + $0xd8] sm:$0xff] }
  0xb1   : > { %v659_v30 = vadd.f32 %v658_v25, %v627_v19  ;;  %v545_v7 = vld [vmem:[#allocation2 + $0xe0] sm:$0xff]  ;;  %v608_v9 = vsub.f32 %v544_v2, %v576_v3  ;;  %v638_v10 = vand.u32 2147483647, %v606_v63  ;;  %v546_v12 = vld [vmem:[#allocation2 + $0x90] sm:$0xff]  ;;  %v549_v27 = vld [vmem:[#allocation2 + $0xa8] sm:$0xff] }
  0xb2   : > { %v578_v13 = vld [vmem:[#allocation3 + $0x30] sm:$0xff]  ;;  %v609_v14 = vsub.f32 %v545_v7, %v577_v8  ;;  %v639_v15 = vand.u32 2147483647, %v607_v4  ;;  %v579_v18 = vld [vmem:[#allocation3 + $0x20] sm:$0xff]  ;;  %v581_v28 = vld [vmem:[#allocation3 + $0x88] sm:$0xff] }
  0xb3   : > { %v660_v35 = vadd.f32 %v659_v30, %v628_v24  ;;  %v547_v17 = vld [vmem:[#allocation2 + $0x70] sm:$0xff]  ;;  %v610_v19 = vsub.f32 %v546_v12, %v578_v13  ;;  %v640_v20 = vand.u32 2147483647, %v608_v9  ;;  %v548_v22 = vld [vmem:[#allocation2 + $0xc0] sm:$0xff]  ;;  %v582_v33 = vld [vmem:[#allocation3 + $0x48] sm:$0xff] }
  0xb4   : > { %v580_v23 = vld [vmem:[#allocation3 + $0xf0] sm:$0xff]  ;;  %v611_v24 = vsub.f32 %v547_v17, %v579_v18  ;;  %v641_v25 = vand.u32 2147483647, %v609_v14  ;;  %v583_v38 = vld [vmem:[#allocation3 + $0xf8] sm:$0xff]  ;;  %v552_v42 = vld [vmem:[#allocation2 + $0x28] sm:$0xff] }
  0xb5   : > { %v661_v40 = vadd.f32 %v660_v35, %v629_v29  ;;  %v612_v29 = vsub.f32 %v548_v22, %v580_v23  ;;  %v642_v30 = vand.u32 2147483647, %v610_v19  ;;  %v550_v32 = vld [vmem:[#allocation2 + $0xd0] sm:$0xff]  ;;  %v584_v43 = vld [vmem:[#allocation3 + $0xc0] sm:$0xff]  ;;  %v585_v48 = vld [vmem:[#allocation3 + $0xb8] sm:$0xff] }
  0xb6   : > { %v643_v35 = vand.u32 2147483647, %v611_v24  ;;  %v551_v37 = vld [vmem:[#allocation2 + $0x10] sm:$0xff]  ;;  %v553_v47 = vld [vmem:[#allocation2 + $0xa0] sm:$0xff]  ;;  %v554_v52 = vld [vmem:[#allocation2 + $0xf8] sm:$0xff] }
  0xb7   : > { %v662_v45 = vadd.f32 %v661_v40, %v630_v34  ;;  %v613_v34 = vsub.f32 %v549_v27, %v581_v28  ;;  %v644_v40 = vand.u32 2147483647, %v612_v29  ;;  %v586_v53 = vld [vmem:[#allocation3] sm:$0xff]  ;;  %v587_v58 = vld [vmem:[#allocation3 + $0x28] sm:$0xff]  ;;  %v556_v62 = vld [vmem:[#allocation2 + $0x98] sm:$0xff] }
  0xb8   : > { %v555_v57 = vld [vmem:[#allocation2 + $0x20] sm:$0xff]  ;;  %v588_v63 = vld [vmem:[#allocation3 + $0x98] sm:$0xff] }
  0xb9   : > { %v663_v50 = vadd.f32 %v662_v45, %v631_v39  ;;  %v614_v39 = vsub.f32 %v550_v32, %v582_v33  ;;  %v645_v45 = vand.u32 2147483647, %v613_v34  ;;  %v620_v3 = vsub.f32 %v556_v62, %v588_v63  ;;  %v653_v12 = vld [vmem:[%s1559_s26] sm:$0xff] }
  0xbb   : > { %v664_v55 = vadd.f32 %v663_v50, %v632_v44  ;;  %v615_v44 = vsub.f32 %v551_v37, %v583_v38  ;;  %v646_v50 = vand.u32 2147483647, %v614_v39  ;;  %v652_v8 = vand.u32 2147483647, %v620_v3 }
  0xbd   : > { %v665_v60 = vadd.f32 %v664_v55, %v633_v49  ;;  %v616_v49 = vsub.f32 %v552_v42, %v584_v43  ;;  %v647_v55 = vand.u32 2147483647, %v615_v44 }
  0xbf   : > { %v666_v1 = vadd.f32 %v665_v60, %v634_v54  ;;  %v617_v54 = vsub.f32 %v553_v47, %v585_v48  ;;  %v648_v60 = vand.u32 2147483647, %v616_v49 }
  0xc1   : > { %v667_v6 = vadd.f32 %v666_v1, %v635_v59  ;;  %v618_v59 = vsub.f32 %v554_v52, %v586_v53  ;;  %v649_v1 = vand.u32 2147483647, %v617_v54 }
  0xc3   : > { %v668_v11 = vadd.f32 %v667_v6, %v636_v0  ;;  %v619_v0 = vsub.f32 %v555_v57, %v587_v58  ;;  %v650_v4 = vand.u32 2147483647, %v618_v59 }
  0xc5   : > { %v669_v16 = vadd.f32 %v668_v11, %v637_v5  ;;  %v651_v6 = vand.u32 2147483647, %v619_v0 }
  0xc7   : > { %v670_v21 = vadd.f32 %v669_v16, %v638_v10 }
  0xc9   : > { %v671_v26 = vadd.f32 %v670_v21, %v639_v15 }
  0xcb   : > { %v672_v31 = vadd.f32 %v671_v26, %v640_v20 }
  0xcd   : > { %v673_v36 = vadd.f32 %v672_v31, %v641_v25 }
  0xcf   : > { %v674_v41 = vadd.f32 %v673_v36, %v642_v30 }
  0xd1   : > { %v675_v46 = vadd.f32 %v674_v41, %v643_v35 }
  0xd3   : > { %v676_v51 = vadd.f32 %v675_v46, %v644_v40 }
  0xd5   : > { %v677_v56 = vadd.f32 %v676_v51, %v645_v45 }
  0xd7   : > { %v678_v61 = vadd.f32 %v677_v56, %v646_v50 }
  0xd9   : > { %v679_v2 = vadd.f32 %v678_v61, %v647_v55 }
  0xdb   : > { %v680_v5 = vadd.f32 %v679_v2, %v648_v60 }
  0xdd   : > { %v681_v7 = vadd.f32 %v680_v5, %v649_v1 }
  0xdf   : > { %v682_v9 = vadd.f32 %v681_v7, %v650_v4 }
  0xe1   : > { %v683_v10 = vadd.f32 %v682_v9, %v651_v6 }
  0xe3   : > { %v684_v11 = vadd.f32 %v683_v10, %v652_v8 }
  0xe5   : > { %v685_v13 = vmul.f32 3.0517578e-05, %v684_v11 }
  0xe7   : > { %v686_v14 = vadd.f32 %v685_v13, %v653_v12 }
  0xe9   : > { %687 = vst [vmem:[%s1559_s26] sm:$0xff] %v686_v14 }
  0xea PF: > { %p1434_p3 = scmp.ne.s32.totalorder %s1480_s21, 1 }
  0xec   : > { %691 = sbr.rel (%p1434_p3) target bundleno = 485 (0x1e5), region = 134 }
  0xf1   : > { %v702_v15 = vld [vmem:[%s2254_s3] sm:$0xff]  ;;  %v704_v16 = vld [vmem:[%s2254_s3 + $0x8] sm:$0xff]  ;;  %v706_v17 = vld [vmem:[%s2254_s3 + $0x10] sm:$0xff] }
  0xf2   : > { %703 = vst [vmem:[#allocation2 + $0xb0] sm:$0xff] %v702_v15  ;;  %v708_v18 = vld [vmem:[%s2254_s3 + $0x18] sm:$0xff]  ;;  %v710_v19 = vld [vmem:[%s2254_s3 + $0x20] sm:$0xff]  ;;  %v712_v20 = vld [vmem:[%s2254_s3 + $0x28] sm:$0xff] }
  0xf3   : > { %705 = vst [vmem:[#allocation2] sm:$0xff] %v704_v16  ;;  %v714_v21 = vld [vmem:[%s2254_s3 + $0x30] sm:$0xff]  ;;  %v716_v22 = vld [vmem:[%s2254_s3 + $0x38] sm:$0xff]  ;;  %v718_v23 = vld [vmem:[%s2254_s3 + $0x40] sm:$0xff] }
  0xf4   : > { %707 = vst [vmem:[#allocation2 + $0xd8] sm:$0xff] %v706_v17  ;;  %v720_v24 = vld [vmem:[%s2254_s3 + $0x48] sm:$0xff]  ;;  %v722_v25 = vld [vmem:[%s2254_s3 + $0x50] sm:$0xff]  ;;  %v724_v26 = vld [vmem:[%s2254_s3 + $0x58] sm:$0xff] }
  0xf5   : > { %709 = vst [vmem:[#allocation2 + $0x18] sm:$0xff] %v708_v18  ;;  %v726_v27 = vld [vmem:[%s2254_s3 + $0x60] sm:$0xff]  ;;  %v728_v28 = vld [vmem:[%s2254_s3 + $0x68] sm:$0xff]  ;;  %v730_v29 = vld [vmem:[%s2254_s3 + $0x70] sm:$0xff] }
  0xf6   : > { %711 = vst [vmem:[#allocation2 + $0x50] sm:$0xff] %v710_v19  ;;  %v732_v30 = vld [vmem:[%s2254_s3 + $0x78] sm:$0xff]  ;;  %v734_v31 = vld [vmem:[%s2254_s3 + $0x80] sm:$0xff]  ;;  %v736_v32 = vld [vmem:[%s2254_s3 + $0x88] sm:$0xff] }
  0xf7   : > { %713 = vst [vmem:[#allocation2 + $0x68] sm:$0xff] %v712_v20  ;;  %v738_v33 = vld [vmem:[%s2254_s3 + $0x90] sm:$0xff]  ;;  %v740_v34 = vld [vmem:[%s2254_s3 + $0x98] sm:$0xff]  ;;  %v742_v35 = vld [vmem:[%s2254_s3 + $0xa0] sm:$0xff] }
  0xf8   : > { %715 = vst [vmem:[#allocation2 + $0x30] sm:$0xff] %v714_v21  ;;  %v744_v36 = vld [vmem:[%s2254_s3 + $0xa8] sm:$0xff]  ;;  %v746_v37 = vld [vmem:[%s2254_s3 + $0xb0] sm:$0xff]  ;;  %v748_v38 = vld [vmem:[%s2254_s3 + $0xb8] sm:$0xff] }
  0xf9   : > { %717 = vst [vmem:[#allocation2 + $0x48] sm:$0xff] %v716_v22  ;;  %v750_v39 = vld [vmem:[%s2254_s3 + $0xc0] sm:$0xff]  ;;  %v752_v40 = vld [vmem:[%s2254_s3 + $0xc8] sm:$0xff]  ;;  %v754_v41 = vld [vmem:[%s2254_s3 + $0xd0] sm:$0xff] }
  0xfa   : > { %719 = vst [vmem:[#allocation2 + $0x80] sm:$0xff] %v718_v23  ;;  %v756_v42 = vld [vmem:[%s2254_s3 + $0xd8] sm:$0xff]  ;;  %v758_v43 = vld [vmem:[%s2254_s3 + $0xe0] sm:$0xff]  ;;  %v760_v44 = vld [vmem:[%s2254_s3 + $0xe8] sm:$0xff] }
  0xfb   : > { %721 = vst [vmem:[#allocation2 + $0x88] sm:$0xff] %v720_v24  ;;  %v762_v45 = vld [vmem:[%s2254_s3 + $0xf0] sm:$0xff]  ;;  %v764_v46 = vld [vmem:[%s2254_s3 + $0xf8] sm:$0xff] }
  0xfc   : > { %723 = vst [vmem:[#allocation2 + $0xe8] sm:$0xff] %v722_v25 }
  0xfd   : > { %725 = vst [vmem:[#allocation2 + $0xb8] sm:$0xff] %v724_v26 }
  0xfe   : > { %727 = vst [vmem:[#allocation2 + $0x60] sm:$0xff] %v726_v27 }
  0xff   : > { %729 = vst [vmem:[#allocation2 + $0xf0] sm:$0xff] %v728_v28 }
 0x100   : > { %731 = vst [vmem:[#allocation2 + $0x8] sm:$0xff] %v730_v29 }
 0x101   : > { %733 = vst [vmem:[#allocation2 + $0x78] sm:$0xff] %v732_v30 }
 0x102   : > { %735 = vst [vmem:[#allocation2 + $0x38] sm:$0xff] %v734_v31 }
 0x103   : > { %737 = vst [vmem:[#allocation2 + $0x58] sm:$0xff] %v736_v32 }
 0x104   : > { %739 = vst [vmem:[#allocation2 + $0x40] sm:$0xff] %v738_v33 }
 0x105   : > { %741 = vst [vmem:[#allocation2 + $0xc8] sm:$0xff] %v740_v34 }
 0x106   : > { %743 = vst [vmem:[#allocation2 + $0xe0] sm:$0xff] %v742_v35 }
 0x107   : > { %745 = vst [vmem:[#allocation2 + $0x90] sm:$0xff] %v744_v36 }
 0x108   : > { %747 = vst [vmem:[#allocation2 + $0x70] sm:$0xff] %v746_v37 }
 0x109   : > { %749 = vst [vmem:[#allocation2 + $0xc0] sm:$0xff] %v748_v38 }
 0x10a   : > { %751 = vst [vmem:[#allocation2 + $0xa8] sm:$0xff] %v750_v39 }
 0x10b   : > { %753 = vst [vmem:[#allocation2 + $0xd0] sm:$0xff] %v752_v40 }
 0x10c   : > { %755 = vst [vmem:[#allocation2 + $0x10] sm:$0xff] %v754_v41 }
 0x10d   : > { %757 = vst [vmem:[#allocation2 + $0x28] sm:$0xff] %v756_v42 }
 0x10e   : > { %759 = vst [vmem:[#allocation2 + $0xa0] sm:$0xff] %v758_v43 }
 0x10f   : > { %761 = vst [vmem:[#allocation2 + $0xf8] sm:$0xff] %v760_v44 }
 0x110   : > { %763 = vst [vmem:[#allocation2 + $0x20] sm:$0xff] %v762_v45 }
 0x111   : > { %765 = vst [vmem:[#allocation2 + $0x98] sm:$0xff] %v764_v46 }
 0x112   : > { %771 = vsyncadd [#allocation4], 4096  ;;  %v783_v47 = vld [vmem:[%s2260_s9] sm:$0xff]  ;;  %v785_v48 = vld [vmem:[%s2260_s9 + $0x8] sm:$0xff] }
 0x113   : > { %784 = vst [vmem:[#allocation3 + $0x80] sm:$0xff] %v783_v47  ;;  %v787_v49 = vld [vmem:[%s2260_s9 + $0x10] sm:$0xff]  ;;  %v789_v50 = vld [vmem:[%s2260_s9 + $0x18] sm:$0xff]  ;;  %v791_v51 = vld [vmem:[%s2260_s9 + $0x20] sm:$0xff] }
 0x114   : > { %786 = vst [vmem:[#allocation3 + $0xc8] sm:$0xff] %v785_v48  ;;  %v793_v52 = vld [vmem:[%s2260_s9 + $0x28] sm:$0xff]  ;;  %v795_v53 = vld [vmem:[%s2260_s9 + $0x30] sm:$0xff]  ;;  %v797_v54 = vld [vmem:[%s2260_s9 + $0x38] sm:$0xff] }
 0x115   : > { %788 = vst [vmem:[#allocation3 + $0xe8] sm:$0xff] %v787_v49  ;;  %v799_v55 = vld [vmem:[%s2260_s9 + $0x40] sm:$0xff]  ;;  %v801_v56 = vld [vmem:[%s2260_s9 + $0x48] sm:$0xff]  ;;  %v803_v57 = vld [vmem:[%s2260_s9 + $0x50] sm:$0xff] }
 0x116   : > { %790 = vst [vmem:[#allocation3 + $0x78] sm:$0xff] %v789_v50  ;;  %v805_v58 = vld [vmem:[%s2260_s9 + $0x58] sm:$0xff]  ;;  %v807_v59 = vld [vmem:[%s2260_s9 + $0x60] sm:$0xff]  ;;  %v809_v60 = vld [vmem:[%s2260_s9 + $0x68] sm:$0xff] }
 0x117   : > { %792 = vst [vmem:[#allocation3 + $0x8] sm:$0xff] %v791_v51  ;;  %v811_v61 = vld [vmem:[%s2260_s9 + $0x70] sm:$0xff]  ;;  %v813_v62 = vld [vmem:[%s2260_s9 + $0x78] sm:$0xff]  ;;  %v815_v63 = vld [vmem:[%s2260_s9 + $0x80] sm:$0xff] }
 0x118   : > { %794 = vst [vmem:[#allocation3 + $0x90] sm:$0xff] %v793_v52  ;;  %v817_v0 = vld [vmem:[%s2260_s9 + $0x88] sm:$0xff]  ;;  %v819_v1 = vld [vmem:[%s2260_s9 + $0x90] sm:$0xff]  ;;  %v821_v2 = vld [vmem:[%s2260_s9 + $0x98] sm:$0xff] }
 0x119   : > { %796 = vst [vmem:[#allocation3 + $0x58] sm:$0xff] %v795_v53  ;;  %v823_v3 = vld [vmem:[%s2260_s9 + $0xa0] sm:$0xff]  ;;  %v825_v4 = vld [vmem:[%s2260_s9 + $0xa8] sm:$0xff]  ;;  %v827_v5 = vld [vmem:[%s2260_s9 + $0xb0] sm:$0xff] }
 0x11a   : > { %798 = vst [vmem:[#allocation3 + $0xa8] sm:$0xff] %v797_v54  ;;  %v829_v6 = vld [vmem:[%s2260_s9 + $0xb8] sm:$0xff]  ;;  %v831_v7 = vld [vmem:[%s2260_s9 + $0xc0] sm:$0xff]  ;;  %v833_v8 = vld [vmem:[%s2260_s9 + $0xc8] sm:$0xff] }
 0x11b   : > { %800 = vst [vmem:[#allocation3 + $0xd0] sm:$0xff] %v799_v55  ;;  %v835_v9 = vld [vmem:[%s2260_s9 + $0xd0] sm:$0xff]  ;;  %v837_v10 = vld [vmem:[%s2260_s9 + $0xd8] sm:$0xff]  ;;  %v839_v11 = vld [vmem:[%s2260_s9 + $0xe0] sm:$0xff] }
 0x11c   : > { %802 = vst [vmem:[#allocation3 + $0xb0] sm:$0xff] %v801_v56  ;;  %v841_v12 = vld [vmem:[%s2260_s9 + $0xe8] sm:$0xff]  ;;  %v843_v13 = vld [vmem:[%s2260_s9 + $0xf0] sm:$0xff]  ;;  %v845_v14 = vld [vmem:[%s2260_s9 + $0xf8] sm:$0xff] }
 0x11d   : > { %804 = vst [vmem:[#allocation3 + $0x38] sm:$0xff] %v803_v57 }
 0x11e   : > { %806 = vst [vmem:[#allocation3 + $0x40] sm:$0xff] %v805_v58 }
 0x11f   : > { %808 = vst [vmem:[#allocation3 + $0xe0] sm:$0xff] %v807_v59 }
 0x120   : > { %810 = vst [vmem:[#allocation3 + $0x60] sm:$0xff] %v809_v60 }
 0x121   : > { %812 = vst [vmem:[#allocation3 + $0x18] sm:$0xff] %v811_v61 }
 0x122   : > { %814 = vst [vmem:[#allocation3 + $0x68] sm:$0xff] %v813_v62 }
 0x123   : > { %816 = vst [vmem:[#allocation3 + $0x10] sm:$0xff] %v815_v63 }
 0x124   : > { %818 = vst [vmem:[#allocation3 + $0x70] sm:$0xff] %v817_v0 }
 0x125   : > { %820 = vst [vmem:[#allocation3 + $0x50] sm:$0xff] %v819_v1 }
 0x126   : > { %822 = vst [vmem:[#allocation3 + $0xa0] sm:$0xff] %v821_v2 }
 0x127   : > { %824 = vst [vmem:[#allocation3 + $0xd8] sm:$0xff] %v823_v3 }
 0x128   : > { %826 = vst [vmem:[#allocation3 + $0x30] sm:$0xff] %v825_v4 }
 0x129   : > { %828 = vst [vmem:[#allocation3 + $0x20] sm:$0xff] %v827_v5 }
 0x12a   : > { %830 = vst [vmem:[#allocation3 + $0xf0] sm:$0xff] %v829_v6 }
 0x12b   : > { %832 = vst [vmem:[#allocation3 + $0x88] sm:$0xff] %v831_v7 }
 0x12c   : > { %834 = vst [vmem:[#allocation3 + $0x48] sm:$0xff] %v833_v8 }
 0x12d   : > { %836 = vst [vmem:[#allocation3 + $0xf8] sm:$0xff] %v835_v9 }
 0x12e   : > { %838 = vst [vmem:[#allocation3 + $0xc0] sm:$0xff] %v837_v10 }
 0x12f   : > { %840 = vst [vmem:[#allocation3 + $0xb8] sm:$0xff] %v839_v11 }
 0x130   : > { %842 = vst [vmem:[#allocation3] sm:$0xff] %v841_v12 }
 0x131   : > { %844 = vst [vmem:[#allocation3 + $0x28] sm:$0xff] %v843_v13 }
 0x132   : > { %846 = vst [vmem:[#allocation3 + $0x98] sm:$0xff] %v845_v14 }
 0x133   : > { %852 = vsyncadd [#allocation4 + $0x2], 4096 }
 0x134   : > { %1466 = dma.done.wait [#allocation4], 4096 }
 0x135   : > { %1467 = vsyncadd [#allocation4], 4294963200 }
 0x136   : > { %1468 = dma.done.wait [#allocation4 + $0x2], 4096 }
 0x137   : > { %1469 = vsyncadd [#allocation4 + $0x2], 4294963200  ;;  %v858_v15 = vld [vmem:[#allocation2 + $0xb0] sm:$0xff]  ;;  %v859_v16 = vld [vmem:[#allocation2] sm:$0xff] }
 0x138   : > { %v890_v17 = vld [vmem:[#allocation3 + $0x80] sm:$0xff]  ;;  %v891_v18 = vld [vmem:[#allocation3 + $0xc8] sm:$0xff]  ;;  %v860_v19 = vld [vmem:[#allocation2 + $0xd8] sm:$0xff] }
 0x139   : > { %v892_v20 = vld [vmem:[#allocation3 + $0xe8] sm:$0xff]  ;;  %v922_v21 = vsub.f32 %v858_v15, %v890_v17  ;;  %v923_v22 = vsub.f32 %v859_v16, %v891_v18  ;;  %v861_v23 = vld [vmem:[#allocation2 + $0x18] sm:$0xff]  ;;  %v862_v26 = vld [vmem:[#allocation2 + $0x50] sm:$0xff] }
 0x13a   : > { %v893_v24 = vld [vmem:[#allocation3 + $0x78] sm:$0xff]  ;;  %v924_v25 = vsub.f32 %v860_v19, %v892_v20  ;;  %v894_v27 = vld [vmem:[#allocation3 + $0x8] sm:$0xff]  ;;  %v895_v32 = vld [vmem:[#allocation3 + $0x90] sm:$0xff] }
 0x13b   : > { %v925_v28 = vsub.f32 %v861_v23, %v893_v24  ;;  %v954_v29 = vand.u32 2147483647, %v922_v21  ;;  %v955_v30 = vand.u32 2147483647, %v923_v22  ;;  %v863_v31 = vld [vmem:[#allocation2 + $0x68] sm:$0xff]  ;;  %v926_v33 = vsub.f32 %v862_v26, %v894_v27  ;;  %v864_v35 = vld [vmem:[#allocation2 + $0x30] sm:$0xff] }
 0x13c   : > { %v956_v34 = vand.u32 2147483647, %v924_v25  ;;  %v896_v36 = vld [vmem:[#allocation3 + $0x58] sm:$0xff]  ;;  %v927_v37 = vsub.f32 %v863_v31, %v895_v32  ;;  %v865_v40 = vld [vmem:[#allocation2 + $0x48] sm:$0xff]  ;;  %v866_v45 = vld [vmem:[#allocation2 + $0x80] sm:$0xff] }
 0x13d   : > { %v957_v38 = vand.u32 2147483647, %v925_v28  ;;  %v987_v39 = vadd.f32 %v955_v30, %v954_v29  ;;  %v897_v41 = vld [vmem:[#allocation3 + $0xa8] sm:$0xff]  ;;  %v928_v42 = vsub.f32 %v864_v35, %v896_v36  ;;  %v958_v43 = vand.u32 2147483647, %v926_v33  ;;  %v898_v46 = vld [vmem:[#allocation3 + $0xd0] sm:$0xff] }
 0x13e   : > { %v929_v47 = vsub.f32 %v865_v40, %v897_v41  ;;  %v959_v48 = vand.u32 2147483647, %v927_v37  ;;  %v867_v50 = vld [vmem:[#allocation2 + $0x88] sm:$0xff]  ;;  %v899_v51 = vld [vmem:[#allocation3 + $0xb0] sm:$0xff]  ;;  %v930_v52 = vsub.f32 %v866_v45, %v898_v46  ;;  %v900_v56 = vld [vmem:[#allocation3 + $0x38] sm:$0xff] }
 0x13f   : > { %v988_v44 = vadd.f32 %v987_v39, %v956_v34  ;;  %v960_v53 = vand.u32 2147483647, %v928_v42  ;;  %v868_v55 = vld [vmem:[#allocation2 + $0xe8] sm:$0xff]  ;;  %v931_v57 = vsub.f32 %v867_v50, %v899_v51  ;;  %v869_v60 = vld [vmem:[#allocation2 + $0xb8] sm:$0xff]  ;;  %v901_v61 = vld [vmem:[#allocation3 + $0x40] sm:$0xff] }
 0x140   : > { %v961_v58 = vand.u32 2147483647, %v929_v47  ;;  %v932_v62 = vsub.f32 %v868_v55, %v900_v56  ;;  %v962_v63 = vand.u32 2147483647, %v930_v52  ;;  %v870_v1 = vld [vmem:[#allocation2 + $0x60] sm:$0xff]  ;;  %v933_v3 = vsub.f32 %v869_v60, %v901_v61  ;;  %v871_v6 = vld [vmem:[#allocation2 + $0xf0] sm:$0xff] }
 0x141   : > { %v989_v49 = vadd.f32 %v988_v44, %v957_v38  ;;  %v902_v2 = vld [vmem:[#allocation3 + $0xe0] sm:$0xff]  ;;  %v963_v4 = vand.u32 2147483647, %v931_v57  ;;  %v872_v11 = vld [vmem:[#allocation2 + $0x8] sm:$0xff]  ;;  %v904_v12 = vld [vmem:[#allocation3 + $0x18] sm:$0xff] }
 0x142   : > { %v903_v7 = vld [vmem:[#allocation3 + $0x60] sm:$0xff]  ;;  %v934_v8 = vsub.f32 %v870_v1, %v902_v2  ;;  %v964_v9 = vand.u32 2147483647, %v932_v62  ;;  %v965_v14 = vand.u32 2147483647, %v933_v3  ;;  %v873_v16 = vld [vmem:[#allocation2 + $0x78] sm:$0xff]  ;;  %v936_v18 = vsub.f32 %v872_v11, %v904_v12 }
 0x143   : > { %v990_v54 = vadd.f32 %v989_v49, %v958_v43  ;;  %v935_v13 = vsub.f32 %v871_v6, %v903_v7  ;;  %v905_v17 = vld [vmem:[#allocation3 + $0x68] sm:$0xff]  ;;  %v874_v21 = vld [vmem:[#allocation2 + $0x38] sm:$0xff]  ;;  %v906_v22 = vld [vmem:[#allocation3 + $0x10] sm:$0xff] }
 0x144   : > { %v966_v19 = vand.u32 2147483647, %v934_v8  ;;  %v937_v23 = vsub.f32 %v873_v16, %v905_v17  ;;  %v875_v26 = vld [vmem:[#allocation2 + $0x58] sm:$0xff]  ;;  %v907_v27 = vld [vmem:[#allocation3 + $0x70] sm:$0xff]  ;;  %v938_v28 = vsub.f32 %v874_v21, %v906_v22  ;;  %v968_v29 = vand.u32 2147483647, %v936_v18 }
 0x145   : > { %v991_v59 = vadd.f32 %v990_v54, %v959_v48  ;;  %v967_v24 = vand.u32 2147483647, %v935_v13  ;;  %v876_v31 = vld [vmem:[#allocation2 + $0x40] sm:$0xff]  ;;  %v908_v32 = vld [vmem:[#allocation3 + $0x50] sm:$0xff]  ;;  %v939_v33 = vsub.f32 %v875_v26, %v907_v27  ;;  %v877_v36 = vld [vmem:[#allocation2 + $0xc8] sm:$0xff] }
 0x146   : > { %v969_v34 = vand.u32 2147483647, %v937_v23  ;;  %v909_v37 = vld [vmem:[#allocation3 + $0xa0] sm:$0xff]  ;;  %v940_v38 = vsub.f32 %v876_v31, %v908_v32  ;;  %v970_v39 = vand.u32 2147483647, %v938_v28  ;;  %v910_v42 = vld [vmem:[#allocation3 + $0xd8] sm:$0xff] }
 0x147   : > { %v992_v0 = vadd.f32 %v991_v59, %v960_v53  ;;  %v878_v41 = vld [vmem:[#allocation2 + $0xe0] sm:$0xff]  ;;  %v941_v43 = vsub.f32 %v877_v36, %v909_v37  ;;  %v971_v44 = vand.u32 2147483647, %v939_v33  ;;  %v879_v46 = vld [vmem:[#allocation2 + $0x90] sm:$0xff]  ;;  %v1033_v59 = vld [vmem:[%s2255_s4 + $0x8] sm:$0xff] }
 0x148   : > { %v911_v47 = vld [vmem:[#allocation3 + $0x30] sm:$0xff]  ;;  %v942_v48 = vsub.f32 %v878_v41, %v910_v42  ;;  %v972_v49 = vand.u32 2147483647, %v940_v38  ;;  %v912_v52 = vld [vmem:[#allocation3 + $0x20] sm:$0xff]  ;;  %v882_v1 = vld [vmem:[#allocation2 + $0xa8] sm:$0xff]  ;;  %1034 = vst [vmem:[#allocation2] sm:$0xff] %v1033_v59 }
 0x149   : > { %v993_v5 = vadd.f32 %v992_v0, %v961_v58  ;;  %v880_v51 = vld [vmem:[#allocation2 + $0x70] sm:$0xff]  ;;  %v881_v53 = vld [vmem:[#allocation2 + $0xc0] sm:$0xff]  ;;  %v943_v55 = vsub.f32 %v879_v46, %v911_v47  ;;  %v973_v56 = vand.u32 2147483647, %v941_v43  ;;  %v1037_v0 = vld [vmem:[%s2255_s4 + $0x18] sm:$0xff] }
 0x14a   : > { %v913_v54 = vld [vmem:[#allocation3 + $0xf0] sm:$0xff]  ;;  %v1031_v58 = vld [vmem:[%s2255_s4] sm:$0xff]  ;;  %v944_v61 = vsub.f32 %v880_v51, %v912_v52  ;;  %v974_v62 = vand.u32 2147483647, %v942_v48  ;;  %v914_v2 = vld [vmem:[#allocation3 + $0x88] sm:$0xff]  ;;  %1038 = vst [vmem:[#allocation2 + $0x18] sm:$0xff] %v1037_v0 }
 0x14b   : > { %v994_v10 = vadd.f32 %v993_v5, %v962_v63  ;;  %v1035_v60 = vld [vmem:[%s2255_s4 + $0x10] sm:$0xff]  ;;  %1032 = vst [vmem:[#allocation2 + $0xb0] sm:$0xff] %v1031_v58  ;;  %v1039_v3 = vld [vmem:[%s2255_s4 + $0x20] sm:$0xff]  ;;  %v975_v5 = vand.u32 2147483647, %v943_v55  ;;  %v1041_v7 = vld [vmem:[%s2255_s4 + $0x28] sm:$0xff]  ;;  %v946_v11 = vsub.f32 %v882_v1, %v914_v2 }
 0x14c   : > { %1036 = vst [vmem:[#allocation2 + $0xd8] sm:$0xff] %v1035_v60  ;;  %v883_v8 = vld [vmem:[#allocation2 + $0xd0] sm:$0xff]  ;;  %v976_v12 = vand.u32 2147483647, %v944_v61  ;;  %v916_v16 = vld [vmem:[#allocation3 + $0xf8] sm:$0xff]  ;;  %v1047_v17 = vld [vmem:[%s2255_s4 + $0x40] sm:$0xff] }
 0x14d   : > { %v995_v15 = vadd.f32 %v994_v10, %v963_v4  ;;  %v945_v4 = vsub.f32 %v881_v53, %v913_v54  ;;  %v1043_v10 = vld [vmem:[%s2255_s4 + $0x30] sm:$0xff]  ;;  %1040 = vst [vmem:[#allocation2 + $0x50] sm:$0xff] %v1039_v3  ;;  %v1049_v21 = vld [vmem:[%s2255_s4 + $0x48] sm:$0xff]  ;;  %v917_v23 = vld [vmem:[#allocation3 + $0xc0] sm:$0xff]  ;;  %v978_v26 = vand.u32 2147483647, %v946_v11 }
 0x14e   : > { %1042 = vst [vmem:[#allocation2 + $0x68] sm:$0xff] %v1041_v7  ;;  %v885_v22 = vld [vmem:[#allocation2 + $0x28] sm:$0xff]  ;;  %v1053_v28 = vld [vmem:[%s2255_s4 + $0x58] sm:$0xff]  ;;  %v1055_v31 = vld [vmem:[%s2255_s4 + $0x60] sm:$0xff] }
 0x14f   : > { %v996_v20 = vadd.f32 %v995_v15, %v964_v9  ;;  %v915_v9 = vld [vmem:[#allocation3 + $0x48] sm:$0xff]  ;;  %v884_v15 = vld [vmem:[#allocation2 + $0x10] sm:$0xff]  ;;  %1044 = vst [vmem:[#allocation2 + $0x30] sm:$0xff] %v1043_v10  ;;  %v949_v32 = vsub.f32 %v885_v22, %v917_v23  ;;  %v887_v36 = vld [vmem:[#allocation2 + $0xf8] sm:$0xff] }
 0x150   : > { %v947_v18 = vsub.f32 %v883_v8, %v915_v9  ;;  %1048 = vst [vmem:[#allocation2 + $0x80] sm:$0xff] %v1047_v17  ;;  %v919_v37 = vld [vmem:[#allocation3] sm:$0xff]  ;;  %v1059_v38 = vld [vmem:[%s2255_s4 + $0x70] sm:$0xff]  ;;  %v1061_v42 = vld [vmem:[%s2255_s4 + $0x78] sm:$0xff] }
 0x151   : > { %v997_v25 = vadd.f32 %v996_v20, %v965_v14  ;;  %v1045_v14 = vld [vmem:[%s2255_s4 + $0x38] sm:$0xff]  ;;  %1050 = vst [vmem:[#allocation2 + $0x88] sm:$0xff] %v1049_v21  ;;  %v888_v43 = vld [vmem:[#allocation2 + $0x20] sm:$0xff]  ;;  %v981_v46 = vand.u32 2147483647, %v949_v32 }
 0x152   : > { %1046 = vst [vmem:[#allocation2 + $0x48] sm:$0xff] %v1045_v14  ;;  %v979_v33 = vand.u32 2147483647, %v947_v18  ;;  %v889_v48 = vld [vmem:[#allocation2 + $0x98] sm:$0xff] }
 0x153   : > { %v998_v30 = vadd.f32 %v997_v25, %v966_v19  ;;  %v977_v19 = vand.u32 2147483647, %v945_v4  ;;  %v948_v25 = vsub.f32 %v884_v15, %v916_v16  ;;  %1054 = vst [vmem:[#allocation2 + $0xb8] sm:$0xff] %v1053_v28 }
 0x154   : > { %1056 = vst [vmem:[#allocation2 + $0x60] sm:$0xff] %v1055_v31 }
 0x155   : > { %v999_v35 = vadd.f32 %v998_v30, %v967_v24  ;;  %v1051_v24 = vld [vmem:[%s2255_s4 + $0x50] sm:$0xff]  ;;  %v918_v30 = vld [vmem:[#allocation3 + $0xb8] sm:$0xff]  ;;  %1060 = vst [vmem:[#allocation2 + $0x8] sm:$0xff] %v1059_v38 }
 0x156   : > { %1052 = vst [vmem:[#allocation2 + $0xe8] sm:$0xff] %v1051_v24 }
 0x157   : > { %v1000_v40 = vadd.f32 %v999_v35, %v968_v29  ;;  %v886_v29 = vld [vmem:[#allocation2 + $0xa0] sm:$0xff]  ;;  %v1057_v35 = vld [vmem:[%s2255_s4 + $0x68] sm:$0xff]  ;;  %1062 = vst [vmem:[#allocation2 + $0x78] sm:$0xff] %v1061_v42 }
 0x158   : > { %1058 = vst [vmem:[#allocation2 + $0xf0] sm:$0xff] %v1057_v35 }
 0x159   : > { %v1001_v45 = vadd.f32 %v1000_v40, %v969_v34  ;;  %v980_v40 = vand.u32 2147483647, %v948_v25 }
 0x15b   : > { %v1002_v50 = vadd.f32 %v1001_v45, %v970_v39  ;;  %v950_v39 = vsub.f32 %v886_v29, %v918_v30  ;;  %v951_v45 = vsub.f32 %v887_v36, %v919_v37 }
 0x15d   : > { %v1003_v57 = vadd.f32 %v1002_v50, %v971_v44  ;;  %v920_v44 = vld [vmem:[#allocation3 + $0x28] sm:$0xff]  ;;  %v982_v51 = vand.u32 2147483647, %v950_v39  ;;  %v983_v54 = vand.u32 2147483647, %v951_v45 }
 0x15e   : > { %v952_v50 = vsub.f32 %v888_v43, %v920_v44 }
 0x15f   : > { %v1004_v63 = vadd.f32 %v1003_v57, %v972_v49  ;;  %v921_v49 = vld [vmem:[#allocation3 + $0x98] sm:$0xff] }
 0x160   : > { %v953_v53 = vsub.f32 %v889_v48, %v921_v49 }
 0x161   : > { %v1005_v6 = vadd.f32 %v1004_v63, %v973_v56  ;;  %v984_v56 = vand.u32 2147483647, %v952_v50 }
 0x162   : > { %v985_v58 = vand.u32 2147483647, %v953_v53 }
 0x163   : > { %v1006_v13 = vadd.f32 %v1005_v6, %v974_v62  ;;  %v986_v62 = vld [vmem:[%s1559_s26] sm:$0xff] }
 0x165   : > { %v1007_v20 = vadd.f32 %v1006_v13, %v975_v5 }
 0x167   : > { %v1008_v27 = vadd.f32 %v1007_v20, %v976_v12 }
 0x169   : > { %v1009_v34 = vadd.f32 %v1008_v27, %v977_v19 }
 0x16b   : > { %v1010_v41 = vadd.f32 %v1009_v34, %v978_v26 }
 0x16d   : > { %v1011_v47 = vadd.f32 %v1010_v41, %v979_v33 }
 0x16f   : > { %v1012_v52 = vadd.f32 %v1011_v47, %v980_v40 }
 0x171   : > { %v1013_v55 = vadd.f32 %v1012_v52, %v981_v46 }
 0x173   : > { %v1014_v57 = vadd.f32 %v1013_v55, %v982_v51 }
 0x175   : > { %v1015_v59 = vadd.f32 %v1014_v57, %v983_v54 }
 0x177   : > { %v1016_v60 = vadd.f32 %v1015_v59, %v984_v56 }
 0x179   : > { %v1017_v61 = vadd.f32 %v1016_v60, %v985_v58 }
 0x17b   : > { %v1018_v63 = vmul.f32 3.0517578e-05, %v1017_v61 }
 0x17d   : > { %v1019_v0 = vadd.f32 %v1018_v63, %v986_v62 }
 0x17f   : > { %1020 = vst [vmem:[%s1559_s26] sm:$0xff] %v1019_v0 }
 0x180   : > { %1068 = vsyncadd [#allocation4], 2048  ;;  %v1079_v1 = vld [vmem:[%s2261_s10] sm:$0xff]  ;;  %v1081_v2 = vld [vmem:[%s2261_s10 + $0x8] sm:$0xff] }
 0x181   : > { %1080 = vst [vmem:[#allocation3 + $0x80] sm:$0xff] %v1079_v1  ;;  %v1083_v3 = vld [vmem:[%s2261_s10 + $0x10] sm:$0xff]  ;;  %v1085_v4 = vld [vmem:[%s2261_s10 + $0x18] sm:$0xff]  ;;  %v1087_v5 = vld [vmem:[%s2261_s10 + $0x20] sm:$0xff] }
 0x182   : > { %1082 = vst [vmem:[#allocation3 + $0xc8] sm:$0xff] %v1081_v2  ;;  %v1089_v6 = vld [vmem:[%s2261_s10 + $0x28] sm:$0xff]  ;;  %v1091_v7 = vld [vmem:[%s2261_s10 + $0x30] sm:$0xff]  ;;  %v1093_v8 = vld [vmem:[%s2261_s10 + $0x38] sm:$0xff] }
 0x183   : > { %1084 = vst [vmem:[#allocation3 + $0xe8] sm:$0xff] %v1083_v3  ;;  %v1095_v9 = vld [vmem:[%s2261_s10 + $0x40] sm:$0xff]  ;;  %v1097_v10 = vld [vmem:[%s2261_s10 + $0x48] sm:$0xff]  ;;  %v1099_v11 = vld [vmem:[%s2261_s10 + $0x50] sm:$0xff] }
 0x184   : > { %1086 = vst [vmem:[#allocation3 + $0x78] sm:$0xff] %v1085_v4  ;;  %v1101_v12 = vld [vmem:[%s2261_s10 + $0x58] sm:$0xff]  ;;  %v1103_v13 = vld [vmem:[%s2261_s10 + $0x60] sm:$0xff]  ;;  %v1105_v14 = vld [vmem:[%s2261_s10 + $0x68] sm:$0xff] }
 0x185   : > { %1088 = vst [vmem:[#allocation3 + $0x8] sm:$0xff] %v1087_v5  ;;  %v1107_v15 = vld [vmem:[%s2261_s10 + $0x70] sm:$0xff]  ;;  %v1109_v16 = vld [vmem:[%s2261_s10 + $0x78] sm:$0xff] }
 0x186   : > { %1090 = vst [vmem:[#allocation3 + $0x90] sm:$0xff] %v1089_v6 }
 0x187   : > { %1092 = vst [vmem:[#allocation3 + $0x58] sm:$0xff] %v1091_v7 }
 0x188   : > { %1094 = vst [vmem:[#allocation3 + $0xa8] sm:$0xff] %v1093_v8 }
 0x189   : > { %1096 = vst [vmem:[#allocation3 + $0xd0] sm:$0xff] %v1095_v9 }
 0x18a   : > { %1098 = vst [vmem:[#allocation3 + $0xb0] sm:$0xff] %v1097_v10 }
 0x18b   : > { %1100 = vst [vmem:[#allocation3 + $0x38] sm:$0xff] %v1099_v11 }
 0x18c   : > { %1102 = vst [vmem:[#allocation3 + $0x40] sm:$0xff] %v1101_v12 }
 0x18d   : > { %1104 = vst [vmem:[#allocation3 + $0xe0] sm:$0xff] %v1103_v13 }
 0x18e   : > { %1106 = vst [vmem:[#allocation3 + $0x60] sm:$0xff] %v1105_v14 }
 0x18f   : > { %1108 = vst [vmem:[#allocation3 + $0x18] sm:$0xff] %v1107_v15 }
 0x190   : > { %1110 = vst [vmem:[#allocation3 + $0x68] sm:$0xff] %v1109_v16 }
 0x191   : > { %1116 = vsyncadd [#allocation4 + $0x2], 2048 }
 0x192   : > { %1470 = dma.done.wait [#allocation4], 2048 }
 0x193   : > { %1471 = vsyncadd [#allocation4], 4294965248 }
 0x194   : > { %1472 = dma.done.wait [#allocation4 + $0x2], 2048 }
 0x195   : > { %1473 = vsyncadd [#allocation4 + $0x2], 4294965248  ;;  %v1122_v17 = vld [vmem:[#allocation2 + $0xb0] sm:$0xff]  ;;  %v1123_v18 = vld [vmem:[#allocation2] sm:$0xff] }
 0x196   : > { %v1124_v19 = vld [vmem:[#allocation2 + $0xd8] sm:$0xff]  ;;  %v1138_v21 = vld [vmem:[#allocation3 + $0x80] sm:$0xff]  ;;  %v1139_v22 = vld [vmem:[#allocation3 + $0xc8] sm:$0xff] }
 0x197   : > { %v1125_v20 = vld [vmem:[#allocation2 + $0x18] sm:$0xff]  ;;  %v1140_v23 = vld [vmem:[#allocation3 + $0xe8] sm:$0xff]  ;;  %v1154_v25 = vsub.f32 %v1122_v17, %v1138_v21  ;;  %v1155_v26 = vsub.f32 %v1123_v18, %v1139_v22  ;;  %v1126_v27 = vld [vmem:[#allocation2 + $0x50] sm:$0xff] }
 0x198   : > { %v1141_v24 = vld [vmem:[#allocation3 + $0x78] sm:$0xff]  ;;  %v1142_v28 = vld [vmem:[#allocation3 + $0x8] sm:$0xff]  ;;  %v1156_v29 = vsub.f32 %v1124_v19, %v1140_v23  ;;  %v1143_v33 = vld [vmem:[#allocation3 + $0x90] sm:$0xff] }
 0x199   : > { %v1157_v30 = vsub.f32 %v1125_v20, %v1141_v24  ;;  %v1170_v31 = vand.u32 2147483647, %v1154_v25  ;;  %v1127_v32 = vld [vmem:[#allocation2 + $0x68] sm:$0xff]  ;;  %v1171_v34 = vand.u32 2147483647, %v1155_v26  ;;  %v1158_v35 = vsub.f32 %v1126_v27, %v1142_v28  ;;  %v1128_v37 = vld [vmem:[#allocation2 + $0x30] sm:$0xff] }
 0x19a   : > { %v1172_v36 = vand.u32 2147483647, %v1156_v29  ;;  %v1144_v38 = vld [vmem:[#allocation3 + $0x58] sm:$0xff]  ;;  %v1159_v39 = vsub.f32 %v1127_v32, %v1143_v33  ;;  %v1129_v42 = vld [vmem:[#allocation2 + $0x48] sm:$0xff]  ;;  %v1130_v44 = vld [vmem:[#allocation2 + $0x80] sm:$0xff] }
 0x19b   : > { %v1173_v40 = vand.u32 2147483647, %v1157_v30  ;;  %v1187_v41 = vadd.f32 %v1171_v34, %v1170_v31  ;;  %v1145_v43 = vld [vmem:[#allocation3 + $0xa8] sm:$0xff]  ;;  %v1160_v45 = vsub.f32 %v1128_v37, %v1144_v38  ;;  %v1174_v46 = vand.u32 2147483647, %v1158_v35  ;;  %v1146_v48 = vld [vmem:[#allocation3 + $0xd0] sm:$0xff] }
 0x19c   : > { %v1215_v49 = vld [vmem:[%s2256_s5] sm:$0xff]  ;;  %v1217_v50 = vld [vmem:[%s2256_s5 + $0x8] sm:$0xff]  ;;  %v1161_v51 = vsub.f32 %v1129_v42, %v1145_v43  ;;  %v1175_v52 = vand.u32 2147483647, %v1159_v39  ;;  %v1219_v54 = vld [vmem:[%s2256_s5 + $0x10] sm:$0xff]  ;;  %v1162_v59 = vsub.f32 %v1130_v44, %v1146_v48 }
 0x19d   : > { %v1188_v47 = vadd.f32 %v1187_v41, %v1172_v36  ;;  %1216 = vst [vmem:[#allocation2 + $0xb0] sm:$0xff] %v1215_v49  ;;  %v1221_v55 = vld [vmem:[%s2256_s5 + $0x18] sm:$0xff]  ;;  %v1131_v56 = vld [vmem:[#allocation2 + $0x88] sm:$0xff]  ;;  %v1147_v57 = vld [vmem:[#allocation3 + $0xb0] sm:$0xff]  ;;  %v1176_v60 = vand.u32 2147483647, %v1160_v45 }
 0x19e   : > { %1218 = vst [vmem:[#allocation2] sm:$0xff] %v1217_v50  ;;  %v1223_v58 = vld [vmem:[%s2256_s5 + $0x20] sm:$0xff]  ;;  %v1225_v62 = vld [vmem:[%s2256_s5 + $0x28] sm:$0xff]  ;;  %v1148_v0 = vld [vmem:[#allocation3 + $0x38] sm:$0xff]  ;;  %v1163_v2 = vsub.f32 %v1131_v56, %v1147_v57  ;;  %v1177_v3 = vand.u32 2147483647, %v1161_v51 }
 0x19f   : > { %v1189_v53 = vadd.f32 %v1188_v47, %v1173_v40  ;;  %1220 = vst [vmem:[#allocation2 + $0xd8] sm:$0xff] %v1219_v54  ;;  %v1132_v63 = vld [vmem:[#allocation2 + $0xe8] sm:$0xff]  ;;  %v1227_v1 = vld [vmem:[%s2256_s5 + $0x30] sm:$0xff]  ;;  %v1229_v5 = vld [vmem:[%s2256_s5 + $0x38] sm:$0xff]  ;;  %v1178_v9 = vand.u32 2147483647, %v1162_v59 }
 0x1a0   : > { %1222 = vst [vmem:[#allocation2 + $0x18] sm:$0xff] %v1221_v55  ;;  %v1133_v6 = vld [vmem:[#allocation2 + $0xb8] sm:$0xff]  ;;  %v1149_v7 = vld [vmem:[#allocation3 + $0x40] sm:$0xff]  ;;  %v1164_v8 = vsub.f32 %v1132_v63, %v1148_v0  ;;  %v1179_v14 = vand.u32 2147483647, %v1163_v2  ;;  %v1135_v16 = vld [vmem:[#allocation2 + $0xf0] sm:$0xff] }
 0x1a1   : > { %v1190_v61 = vadd.f32 %v1189_v53, %v1174_v46  ;;  %1224 = vst [vmem:[#allocation2 + $0x50] sm:$0xff] %v1223_v58  ;;  %v1134_v11 = vld [vmem:[#allocation2 + $0x60] sm:$0xff]  ;;  %v1165_v13 = vsub.f32 %v1133_v6, %v1149_v7  ;;  %v1136_v21 = vld [vmem:[#allocation2 + $0x8] sm:$0xff]  ;;  %v1152_v22 = vld [vmem:[#allocation3 + $0x18] sm:$0xff] }
 0x1a2   : > { %1226 = vst [vmem:[#allocation2 + $0x68] sm:$0xff] %v1225_v62  ;;  %v1150_v12 = vld [vmem:[#allocation3 + $0xe0] sm:$0xff]  ;;  %v1180_v19 = vand.u32 2147483647, %v1164_v8  ;;  %v1137_v26 = vld [vmem:[#allocation2 + $0x78] sm:$0xff]  ;;  %v1153_v27 = vld [vmem:[#allocation3 + $0x68] sm:$0xff]  ;;  %v1168_v28 = vsub.f32 %v1136_v21, %v1152_v22 }
 0x1a3   : > { %v1191_v4 = vadd.f32 %v1190_v61, %v1175_v52  ;;  %1228 = vst [vmem:[#allocation2 + $0x30] sm:$0xff] %v1227_v1  ;;  %v1151_v17 = vld [vmem:[#allocation3 + $0x60] sm:$0xff]  ;;  %v1166_v18 = vsub.f32 %v1134_v11, %v1150_v12  ;;  %v1181_v24 = vand.u32 2147483647, %v1165_v13  ;;  %v1169_v31 = vsub.f32 %v1137_v26, %v1153_v27 }
 0x1a4   : > { %1230 = vst [vmem:[#allocation2 + $0x48] sm:$0xff] %v1229_v5  ;;  %v1167_v23 = vsub.f32 %v1135_v16, %v1151_v17  ;;  %v1184_v34 = vand.u32 2147483647, %v1168_v28  ;;  %v1186_v40 = vld [vmem:[%s1559_s26] sm:$0xff] }
 0x1a5   : > { %v1192_v10 = vadd.f32 %v1191_v4, %v1176_v60  ;;  %v1182_v29 = vand.u32 2147483647, %v1166_v18  ;;  %v1185_v36 = vand.u32 2147483647, %v1169_v31 }
 0x1a6   : > { %v1183_v32 = vand.u32 2147483647, %v1167_v23 }
 0x1a7   : > { %v1193_v15 = vadd.f32 %v1192_v10, %v1177_v3 }
 0x1a9   : > { %v1194_v20 = vadd.f32 %v1193_v15, %v1178_v9 }
 0x1ab   : > { %v1195_v25 = vadd.f32 %v1194_v20, %v1179_v14 }
 0x1ad   : > { %v1196_v30 = vadd.f32 %v1195_v25, %v1180_v19 }
 0x1af   : > { %v1197_v33 = vadd.f32 %v1196_v30, %v1181_v24 }
 0x1b1   : > { %v1198_v35 = vadd.f32 %v1197_v33, %v1182_v29 }
 0x1b3   : > { %v1199_v37 = vadd.f32 %v1198_v35, %v1183_v32 }
 0x1b5   : > { %v1200_v38 = vadd.f32 %v1199_v37, %v1184_v34 }
 0x1b7   : > { %v1201_v39 = vadd.f32 %v1200_v38, %v1185_v36 }
 0x1b9   : > { %v1202_v41 = vmul.f32 6.1035156e-05, %v1201_v39 }
 0x1bb   : > { %v1203_v42 = vadd.f32 %v1202_v41, %v1186_v40 }
 0x1bd   : > { %1204 = vst [vmem:[%s1559_s26] sm:$0xff] %v1203_v42 }
 0x1be   : > { %1236 = vsyncadd [#allocation4], 1024  ;;  %v1247_v43 = vld [vmem:[%s2262_s11] sm:$0xff]  ;;  %v1249_v44 = vld [vmem:[%s2262_s11 + $0x8] sm:$0xff] }
 0x1bf   : > { %1248 = vst [vmem:[#allocation3 + $0x80] sm:$0xff] %v1247_v43  ;;  %v1251_v45 = vld [vmem:[%s2262_s11 + $0x10] sm:$0xff]  ;;  %v1253_v46 = vld [vmem:[%s2262_s11 + $0x18] sm:$0xff]  ;;  %v1255_v47 = vld [vmem:[%s2262_s11 + $0x20] sm:$0xff] }
 0x1c0   : > { %1250 = vst [vmem:[#allocation3 + $0xc8] sm:$0xff] %v1249_v44  ;;  %v1257_v48 = vld [vmem:[%s2262_s11 + $0x28] sm:$0xff]  ;;  %v1259_v49 = vld [vmem:[%s2262_s11 + $0x30] sm:$0xff]  ;;  %v1261_v50 = vld [vmem:[%s2262_s11 + $0x38] sm:$0xff] }
 0x1c1   : > { %1252 = vst [vmem:[#allocation3 + $0xe8] sm:$0xff] %v1251_v45 }
 0x1c2   : > { %1254 = vst [vmem:[#allocation3 + $0x78] sm:$0xff] %v1253_v46 }
 0x1c3   : > { %1256 = vst [vmem:[#allocation3 + $0x8] sm:$0xff] %v1255_v47 }
 0x1c4   : > { %1258 = vst [vmem:[#allocation3 + $0x90] sm:$0xff] %v1257_v48 }
 0x1c5   : > { %1260 = vst [vmem:[#allocation3 + $0x58] sm:$0xff] %v1259_v49 }
 0x1c6   : > { %1262 = vst [vmem:[#allocation3 + $0xa8] sm:$0xff] %v1261_v50 }
 0x1c7   : > { %1268 = vsyncadd [#allocation4 + $0x2], 1024 }
 0x1c8   : > { %1474 = dma.done.wait [#allocation4], 1024 }
 0x1c9   : > { %1475 = vsyncadd [#allocation4], 4294966272 }
 0x1ca   : > { %1476 = dma.done.wait [#allocation4 + $0x2], 1024 }
 0x1cb   : > { %1477 = vsyncadd [#allocation4 + $0x2], 4294966272  ;;  %v1274_v51 = vld [vmem:[#allocation2 + $0xb0] sm:$0xff]  ;;  %v1275_v52 = vld [vmem:[#allocation2] sm:$0xff] }
 0x1cc   : > { %v1276_v53 = vld [vmem:[#allocation2 + $0xd8] sm:$0xff]  ;;  %v1278_v55 = vld [vmem:[#allocation2 + $0x50] sm:$0xff]  ;;  %v1282_v56 = vld [vmem:[#allocation3 + $0x80] sm:$0xff] }
 0x1cd   : > { %v1277_v54 = vld [vmem:[#allocation2 + $0x18] sm:$0xff]  ;;  %v1283_v57 = vld [vmem:[#allocation3 + $0xc8] sm:$0xff]  ;;  %v1290_v60 = vsub.f32 %v1274_v51, %v1282_v56  ;;  %v1287_v2 = vld [vmem:[#allocation3 + $0x90] sm:$0xff] }
 0x1ce   : > { %v1284_v58 = vld [vmem:[#allocation3 + $0xe8] sm:$0xff]  ;;  %v1285_v59 = vld [vmem:[#allocation3 + $0x78] sm:$0xff]  ;;  %v1291_v62 = vsub.f32 %v1275_v52, %v1283_v57  ;;  %v1280_v7 = vld [vmem:[#allocation2 + $0x30] sm:$0xff] }
 0x1cf   : > { %v1286_v61 = vld [vmem:[#allocation3 + $0x8] sm:$0xff]  ;;  %v1292_v63 = vsub.f32 %v1276_v53, %v1284_v58  ;;  %v1293_v0 = vsub.f32 %v1277_v54, %v1285_v59  ;;  %v1298_v3 = vand.u32 2147483647, %v1290_v60  ;;  %v1288_v8 = vld [vmem:[#allocation3 + $0x58] sm:$0xff]  ;;  %v1306_v26 = vld [vmem:[%s1559_s26] sm:$0xff] }
 0x1d0   : > { %v1279_v1 = vld [vmem:[#allocation2 + $0x68] sm:$0xff]  ;;  %v1294_v4 = vsub.f32 %v1278_v55, %v1286_v61  ;;  %v1299_v5 = vand.u32 2147483647, %v1291_v62  ;;  %v1296_v14 = vsub.f32 %v1280_v7, %v1288_v8 }
 0x1d1   : > { %v1300_v6 = vand.u32 2147483647, %v1292_v63  ;;  %v1295_v9 = vsub.f32 %v1279_v1, %v1287_v2  ;;  %v1301_v10 = vand.u32 2147483647, %v1293_v0  ;;  %v1281_v12 = vld [vmem:[#allocation2 + $0x48] sm:$0xff] }
 0x1d2   : > { %v1307_v11 = vadd.f32 %v1299_v5, %v1298_v3  ;;  %v1289_v13 = vld [vmem:[#allocation3 + $0xa8] sm:$0xff]  ;;  %v1302_v15 = vand.u32 2147483647, %v1294_v4  ;;  %v1304_v20 = vand.u32 2147483647, %v1296_v14 }
 0x1d3   : > { %v1297_v17 = vsub.f32 %v1281_v12, %v1289_v13  ;;  %v1303_v18 = vand.u32 2147483647, %v1295_v9 }
 0x1d4   : > { %v1308_v16 = vadd.f32 %v1307_v11, %v1300_v6 }
 0x1d5   : > { %v1305_v22 = vand.u32 2147483647, %v1297_v17 }
 0x1d6   : > { %v1309_v19 = vadd.f32 %v1308_v16, %v1301_v10 }
 0x1d8   : > { %v1310_v21 = vadd.f32 %v1309_v19, %v1302_v15 }
 0x1da   : > { %v1311_v23 = vadd.f32 %v1310_v21, %v1303_v18 }
 0x1dc   : > { %v1312_v24 = vadd.f32 %v1311_v23, %v1304_v20 }
 0x1de   : > { %v1313_v25 = vadd.f32 %v1312_v24, %v1305_v22 }
 0x1e0   : > { %v1314_v27 = vmul.f32 0.00012207031, %v1313_v25 }
 0x1e2   : > { %v1315_v28 = vadd.f32 %v1314_v27, %v1306_v26 }
 0x1e4   : > { %1316 = vst [vmem:[%s1559_s26] sm:$0xff] %v1315_v28 }
 0x1e5 PF: > { %s22_s21 = sadd.s32 1, %s1480_s21  }
 0x1e6   : > { %p19_p4 = scmp.ge.s32.totalorder %s22_s21, 3  }
 0x1e8   :  { %21 = sbr.rel (!%p19_p4) target bundleno = 1 (0x1), region = 328 }
 0x1ed   :  { %1336 = vsyncmov [#allocation4] }
 0x1f0   :  { %s1337_s27 = vpop.sfrf %1336 }
 0x1f1   :  { %p1437_p5 = scmp.ne.s32.totalorder %s1337_s27, 0 }
 0x1f3   :  { %1341 = shalt.err (%p1437_p5)  }
 0x1f4   :  { %1343 = vsyncmov [#allocation4 + $0x1] }
 0x1f7   :  { %s1344_s28 = vpop.sfrf %1343 }
 0x1f8   :  { %p1438_p6 = scmp.ne.s32.totalorder %s1344_s28, 0 }
 0x1fa   :  { %1348 = shalt.err (%p1438_p6)  }
 0x1fb   :  { %1350 = vsyncmov [#allocation4 + $0x2] }
 0x1fe   :  { %s1351_s29 = vpop.sfrf %1350 }
 0x1ff   :  { %p1439_p7 = scmp.ne.s32.totalorder %s1351_s29, 0 }
 0x201   :  { %1355 = shalt.err (%p1439_p7)  }
 0x202   :  { %1357 = vsyncmov [#allocation4 + $0x3] }
 0x205   :  { %s1358_s26 = vpop.sfrf %1357 }
 0x206   :  { %p1440_p8 = scmp.ne.s32.totalorder %s1358_s26, 0 }
 0x208   :  { %1362 = shalt.err (%p1440_p8)  }

</bundles_post_ra>
